<compile_context>
chip_gen: v5e
topology: v5e:2x2
jax: 0.10.0
libtpu: 0.0.40
codegen_flags: <defaults>
</compile_context>

<pallas_src>
import jax
import jax.numpy as jnp
import numpy as np
from jax import lax
from jax.experimental import pallas as pl
from jax.experimental.pallas import tpu as pltpu

EPS = 1e-5

# ----------------------------------------------------------------------------
# Parameter packing (44 scalars, all convs are 1->1 channel):
#   0: conv1_w        1: conv1_b
#   2: ca1_w          3: ca1_b           (channel_attention 1x1)
#   4: ca_bn1_g       5: ca_bn1_b
#   6..14: ca2_w(3x3) 15: ca2_b          (channel_attention 3x3)
#  16: ca_bn2_g      17: ca_bn2_b
#  18: ca3_w         19: ca3_b           (channel_attention 1x1)
#  20..28: rc1_w(3x3) 29: rc1_b          (residual 3x3 #1)
#  30: rc_bn1_g      31: rc_bn1_b
#  32..40: rc2_w(3x3) 41: rc2_b          (residual 3x3 #2)
#  42: rc_bn2_g      43: rc_bn2_b
# ----------------------------------------------------------------------------
N_PARAMS = 44


def _make_edge_kernel(N, H, W, HWp):
    """Build the kernel for static shapes: N batch, HxW image, HWp >= H*W lanes."""
    HW = H * W
    padded = HWp != HW
    inv_count = 1.0 / float(N * HW)

    def kernel(p_ref, lr_ref, x_ref, o_ref):
        # ---- boundary masks, all at (1, HWp); broadcast over N only at use ----
        # Row masks straight from an iota (no div/mod, no table):
        #   up    <=> row >= 1    <=> p >= W
        #   down  <=> row <= H-2  <=> p < (H-1)*W
        idx = lax.broadcasted_iota(jnp.int32, (1, HWp), 1)
        up = idx >= W
        down = idx < (H - 1) * W
        # Column masks from the packed int8 bitmask (bit0: col>=1, bit1: col<=W-2).
        bits = lr_ref[...].astype(jnp.int32)
        left = (bits & 1) > 0
        right = (bits & 2) > 0
        # Real (non lane-pad) positions, for BN statistics only.
        valid = (idx < HW) if padded else None

        def tap_wmask(dy, dx, w):
            # (1, HWp) float mask with the tap weight folded in.
            m = None
            if dy == -1:
                m = up
            elif dy == 1:
                m = down
            if dx == -1:
                m = left if m is None else (m & left)
            elif dx == 1:
                m = right if m is None else (m & right)
            return m.astype(jnp.float32) * w

        def bn(t, g_off, b_off, relu):
            # Training-mode BatchNorm2d: biased batch stats over (N, H, W).
            # Single pass; sum and sum-of-squares fused into ONE lane-reduction
            # chain; gamma/beta folded into y = t*scale + shift.
            ts = jnp.where(valid, t, 0.0) if padded else t
            stacked = jnp.stack([ts, ts * ts])              # (2, N, HWp)
            part = jnp.sum(stacked, axis=2)                 # (2, N)  lane reduce
            sums = jnp.sum(part, axis=1, keepdims=True)     # (2, 1)  tiny finish
            m = sums[0:1, :] * inv_count                    # (1, 1)
            v = jnp.maximum(sums[1:2, :] * inv_count - m * m, 0.0)
            scale = lax.rsqrt(v + EPS) * p_ref[g_off]
            shift = p_ref[b_off] - m * scale
            y = t * scale + shift
            return jnp.maximum(y, 0.0) if relu else y

        def conv3x3(t, w_off, b_off):
            # 3x3 cross-correlation, padding=1, fully in registers: centre tap
            # needs no shift/mask; each neighbour tap is one lane roll (XLU)
            # plus mul/add against a weight-folded (1, HWp) boundary mask.
            acc = t * p_ref[w_off + 4]                      # centre tap first
            for k in range(9):
                if k == 4:
                    continue
                dy, dx = k // 3 - 1, k % 3 - 1
                shift = (-(dy * W + dx)) % HWp
                tap = pltpu.roll(t, shift=shift, axis=1)    # tap[p] = t[p + dy*W + dx]
                wm = tap_wmask(dy, dx, p_ref[w_off + k])
                acc = acc + tap * wm
            return acc + p_ref[b_off]                       # bias added once

        x = x_ref[...]

        # conv1 (1x1)
        x1 = x * p_ref[0] + p_ref[1]

        # channel-attention branch
        a = x1 * p_ref[2] + p_ref[3]
        a = bn(a, 4, 5, relu=True)
        a = conv3x3(a, 6, 15)
        a = bn(a, 16, 17, relu=True)
        a = a * p_ref[18] + p_ref[19]
        # sigmoid(a) = 0.5*tanh(0.5*a) + 0.5 : one EUP push, full f32 accuracy.
        attention = 0.5 * jnp.tanh(0.5 * a) + 0.5
        x_att = x1 * attention

        # residual branch
        res = conv3x3(x_att, 20, 29)
        res = bn(res, 30, 31, relu=True)
        res = conv3x3(res, 32, 41)
        res = bn(res, 42, 43, relu=False)

        out = jnp.maximum(x_att + res, 0.0)
        # avg_pool2d(k=1,s=1) + max_pool2d(k=1,s=1) == out + out
        o_ref[...] = out + out

    return kernel


@jax.jit
def edge_forward(x_nchw, params):
    """x_nchw: (N, 1, H, W) float32; params: (44,) float32 -> (N, 1, H, W)."""
    N, C, H, W = x_nchw.shape
    assert C == 1
    HW = H * W
    HWp = ((HW + 127) // 128) * 128        # lane-dense last dim (multiple of 128)

    x = x_nchw.astype(jnp.float32).reshape(N, HW)
    if HWp != HW:
        x = jnp.pad(x, ((0, 0), (0, HWp - HW)))

    # Packed int8 column-boundary bitmask (host-side numpy, static shapes):
    #   bit 0: col >= 1 (left tap valid), bit 1: col <= W-2 (right tap valid).
    col = np.arange(HWp, dtype=np.int64) % W
    lr_np = ((col >= 1) * 1 + (col <= W - 2) * 2).astype(np.int8)
    lr = jnp.asarray(lr_np.reshape(1, HWp))

    # Raise the scoped-VMEM limit for bigger fused images (v5e default 16 MiB,
    # v6e/v7x 32 MiB), but stay below v7x's 64 MiB physical VMEM. Beyond that
    # the kernel needs the tiled multi-pass design (see TODO above).
    kwargs = {}
    est_vmem = 18 * N * HWp * 4            # rough upper bound of live f32 state
    if est_vmem > 30 * (1 << 20):
        kwargs["compiler_params"] = pltpu.CompilerParams(
            vmem_limit_bytes=min(est_vmem, 60 * (1 << 20)))

    out = pl.pallas_call(
        _make_edge_kernel(N, H, W, HWp),
        out_shape=jax.ShapeDtypeStruct((N, HWp), jnp.float32),
        in_specs=[
            pl.BlockSpec(memory_space=pltpu.MemorySpace.SMEM),   # 44 scalar params
            pl.BlockSpec(memory_space=pltpu.MemorySpace.VMEM),   # int8 col bitmask
            pl.BlockSpec(memory_space=pltpu.MemorySpace.VMEM),   # x, (N, HWp)
        ],
        out_specs=pl.BlockSpec(memory_space=pltpu.MemorySpace.VMEM),
        input_output_aliases={2: 0},     # x is dead after its first read
        **kwargs,
    )(params.astype(jnp.float32), lr, x)

    return out[:, :HW].reshape(N, C, H, W)


# ----------------------------------------------------------------------------
# Pure-JAX reference (mirrors the PyTorch forward, training-mode BN).
# ----------------------------------------------------------------------------
def _conv3x3_ref(x, w9, b):
    w = w9.reshape(1, 1, 3, 3)
    return lax.conv_general_dilated(x, w, (1, 1), ((1, 1), (1, 1))) + b


def _bn_ref(x, g, be, relu):
    m = x.mean()
    v = ((x - m) ** 2).mean()
    y = (x - m) / jnp.sqrt(v + EPS) * g + be
    return jnp.maximum(y, 0.0) if relu else y


def edge_reference(x, p):
    x1 = x * p[0] + p[1]
    a = x1 * p[2] + p[3]
    a = _bn_ref(a, p[4], p[5], True)
    a = _conv3x3_ref(a, p[6:15], p[15])
    a = _bn_ref(a, p[16], p[17], True)
    a = a * p[18] + p[19]
    attention = jax.nn.sigmoid(a)
    x_att = x1 * attention
    r = _conv3x3_ref(x_att, p[20:29], p[29])
    r = _bn_ref(r, p[30], p[31], True)
    r = _conv3x3_ref(r, p[32:41], p[41])
    r = _bn_ref(r, p[42], p[43], False)
    out = jnp.maximum(x_att + r, 0.0)
    return out + out


if __name__ == "__main__":
    key = jax.random.PRNGKey(0)
    kx, kw, kx2 = jax.random.split(key, 3)

    # deterministic synthetic parameters
    params = 0.3 * jax.random.normal(kw, (N_PARAMS,), dtype=jnp.float32)
    # BN gammas near 1, betas near 0
    for g_idx in (4, 16, 30, 42):
        params = params.at[g_idx].set(1.0 + 0.05 * params[g_idx])
    for b_idx in (5, 17, 31, 43):
        params = params.at[b_idx].set(0.05 * params[b_idx])

    # Case 1: small input consistent with the module; H*W is a multiple of 128.
    x1 = jax.random.normal(kx, (2, 1, 16, 16), dtype=jnp.float32)
    out1 = jax.block_until_ready(edge_forward(x1, params))
    ref1 = edge_reference(x1, params)
    np.testing.assert_allclose(np.asarray(out1), np.asarray(ref1),
                               rtol=1e-3, atol=1e-3)

    # Case 2: H*W = 100 (not a multiple of 128) — exercises the lane-padded
    # path, the `valid` BN mask, and the roll-into-pad boundary masking.
    x2 = jax.random.normal(kx2, (2, 1, 10, 10), dtype=jnp.float32)
    out2 = jax.block_until_ready(edge_forward(x2, params))
    ref2 = edge_reference(x2, params)
    np.testing.assert_allclose(np.asarray(out2), np.asarray(ref2),
                               rtol=1e-3, atol=1e-3)

    print("KERNEL_OK")
</pallas_src>

<mosaic_0001>
module attributes {stable_mosaic.version = 11 : i64} {
  func.func @kernel(%arg0: memref<44xf32, #tpu.memory_space<smem>>, %arg1: memref<1x256xi8, #tpu.memory_space<vmem>>, %arg2: memref<2x256xf32, #tpu.memory_space<vmem>>, %arg3: memref<2x256xf32, #tpu.memory_space<vmem>>) attributes {dimension_semantics = [], scalar_prefetch = 0 : i64, scratch_operands = 0 : i64, tpu.core_type = #tpu.core_type<tc>} {
    %0 = tpu.iota {dimensions = array<i32: 1>} : vector<1x256xi32>
    %c16_i32 = arith.constant 16 : i32
    %1 = vector.broadcast %c16_i32 : i32 to vector<1x256xi32>
    %2 = arith.cmpi sge, %0, %1 : vector<1x256xi32>
    %c240_i32 = arith.constant 240 : i32
    %3 = vector.broadcast %c240_i32 : i32 to vector<1x256xi32>
    %4 = arith.cmpi slt, %0, %3 : vector<1x256xi32>
    %c0 = arith.constant 0 : index
    %c0_0 = arith.constant 0 : index
    %5 = vector.load %arg1[%c0, %c0_0] : memref<1x256xi8, #tpu.memory_space<vmem>>, vector<1x256xi8>
    %6 = arith.extsi %5 : vector<1x256xi8> to vector<1x256xi32>
    %c1_i32 = arith.constant 1 : i32
    %7 = vector.broadcast %c1_i32 : i32 to vector<1x256xi32>
    %8 = arith.andi %6, %7 : vector<1x256xi32>
    %c0_i32 = arith.constant 0 : i32
    %9 = vector.broadcast %c0_i32 : i32 to vector<1x256xi32>
    %10 = arith.cmpi sgt, %8, %9 : vector<1x256xi32>
    %c2_i32 = arith.constant 2 : i32
    %11 = vector.broadcast %c2_i32 : i32 to vector<1x256xi32>
    %12 = arith.andi %6, %11 : vector<1x256xi32>
    %c0_i32_1 = arith.constant 0 : i32
    %13 = vector.broadcast %c0_i32_1 : i32 to vector<1x256xi32>
    %14 = arith.cmpi sgt, %12, %13 : vector<1x256xi32>
    %c0_2 = arith.constant 0 : index
    %c0_3 = arith.constant 0 : index
    %15 = vector.load %arg2[%c0_2, %c0_3] : memref<2x256xf32, #tpu.memory_space<vmem>>, vector<2x256xf32>
    %c0_4 = arith.constant 0 : index
    %16 = memref.load %arg0[%c0_4] : memref<44xf32, #tpu.memory_space<smem>>
    %17 = vector.broadcast %16 : f32 to vector<2x256xf32>
    %18 = arith.mulf %15, %17 : vector<2x256xf32>
    %c1 = arith.constant 1 : index
    %19 = memref.load %arg0[%c1] : memref<44xf32, #tpu.memory_space<smem>>
    %20 = vector.broadcast %19 : f32 to vector<2x256xf32>
    %21 = arith.addf %18, %20 : vector<2x256xf32>
    %c2 = arith.constant 2 : index
    %22 = memref.load %arg0[%c2] : memref<44xf32, #tpu.memory_space<smem>>
    %23 = vector.broadcast %22 : f32 to vector<2x256xf32>
    %24 = arith.mulf %21, %23 : vector<2x256xf32>
    %c3 = arith.constant 3 : index
    %25 = memref.load %arg0[%c3] : memref<44xf32, #tpu.memory_space<smem>>
    %26 = vector.broadcast %25 : f32 to vector<2x256xf32>
    %27 = arith.addf %24, %26 : vector<2x256xf32>
    %28 = arith.mulf %27, %27 : vector<2x256xf32>
    %29 = vector.shape_cast %27 : vector<2x256xf32> to vector<1x2x256xf32>
    %30 = vector.shape_cast %28 : vector<2x256xf32> to vector<1x2x256xf32>
    %31 = tpu.concatenate %29, %30 in 0 : vector<1x2x256xf32>, vector<1x2x256xf32> -> vector<2x2x256xf32>
    %cst = arith.constant dense<0.000000e+00> : vector<2x2xf32>
    %32 = vector.multi_reduction <add>, %31, %cst [2] : vector<2x2x256xf32> to vector<2x2xf32>
    %cst_5 = arith.constant dense<0.000000e+00> : vector<2xf32>
    %33 = vector.multi_reduction <add>, %32, %cst_5 [1] : vector<2x2xf32> to vector<2xf32>
    %34 = vector.shape_cast %33 : vector<2xf32> to vector<2x1xf32>
    %35 = vector.extract_strided_slice %34 {offsets = [0, 0], sizes = [1, 1], strides = [1, 1]} : vector<2x1xf32> to vector<1x1xf32>
    %cst_6 = arith.constant 0.001953125 : f32
    %36 = vector.broadcast %cst_6 : f32 to vector<1x1xf32>
    %37 = arith.mulf %35, %36 : vector<1x1xf32>
    %38 = vector.extract_strided_slice %34 {offsets = [1, 0], sizes = [1, 1], strides = [1, 1]} : vector<2x1xf32> to vector<1x1xf32>
    %cst_7 = arith.constant 0.001953125 : f32
    %39 = vector.broadcast %cst_7 : f32 to vector<1x1xf32>
    %40 = arith.mulf %38, %39 : vector<1x1xf32>
    %41 = arith.mulf %37, %37 : vector<1x1xf32>
    %42 = arith.subf %40, %41 : vector<1x1xf32>
    %cst_8 = arith.constant 0.000000e+00 : f32
    %43 = vector.broadcast %cst_8 : f32 to vector<1x1xf32>
    %44 = arith.maximumf %42, %43 : vector<1x1xf32>
    %cst_9 = arith.constant 9.99999974E-6 : f32
    %45 = vector.broadcast %cst_9 : f32 to vector<1x1xf32>
    %46 = arith.addf %44, %45 : vector<1x1xf32>
    %47 = math.rsqrt %46 : vector<1x1xf32>
    %c4 = arith.constant 4 : index
    %48 = memref.load %arg0[%c4] : memref<44xf32, #tpu.memory_space<smem>>
    %49 = vector.broadcast %48 : f32 to vector<1x1xf32>
    %50 = arith.mulf %47, %49 : vector<1x1xf32>
    %c5 = arith.constant 5 : index
    %51 = memref.load %arg0[%c5] : memref<44xf32, #tpu.memory_space<smem>>
    %52 = arith.mulf %37, %50 : vector<1x1xf32>
    %53 = vector.broadcast %51 : f32 to vector<1x1xf32>
    %54 = arith.subf %53, %52 : vector<1x1xf32>
    %55 = vector.broadcast %50 : vector<1x1xf32> to vector<2x256xf32>
    %56 = arith.mulf %27, %55 : vector<2x256xf32>
    %57 = vector.broadcast %54 : vector<1x1xf32> to vector<2x256xf32>
    %58 = arith.addf %56, %57 : vector<2x256xf32>
    %cst_10 = arith.constant 0.000000e+00 : f32
    %59 = vector.broadcast %cst_10 : f32 to vector<2x256xf32>
    %60 = arith.maximumf %58, %59 : vector<2x256xf32>
    %c10 = arith.constant 10 : index
    %61 = memref.load %arg0[%c10] : memref<44xf32, #tpu.memory_space<smem>>
    %62 = vector.broadcast %61 : f32 to vector<2x256xf32>
    %63 = arith.mulf %60, %62 : vector<2x256xf32>
    %c17_i32 = arith.constant 17 : i32
    %64 = tpu.dynamic_rotate %60 by %c17_i32 dim 1 : vector<2x256xf32>, i32 -> vector<2x256xf32>
    %c6 = arith.constant 6 : index
    %65 = memref.load %arg0[%c6] : memref<44xf32, #tpu.memory_space<smem>>
    %66 = arith.andi %2, %10 : vector<1x256xi1>
    %67 = arith.extui %66 : vector<1x256xi1> to vector<1x256xi32>
    %68 = arith.sitofp %67 : vector<1x256xi32> to vector<1x256xf32>
    %69 = vector.broadcast %65 : f32 to vector<1x256xf32>
    %70 = arith.mulf %68, %69 : vector<1x256xf32>
    %71 = vector.broadcast %70 : vector<1x256xf32> to vector<2x256xf32>
    %72 = arith.mulf %64, %71 : vector<2x256xf32>
    %73 = arith.addf %63, %72 : vector<2x256xf32>
    %c16_i32_11 = arith.constant 16 : i32
    %74 = tpu.dynamic_rotate %60 by %c16_i32_11 dim 1 : vector<2x256xf32>, i32 -> vector<2x256xf32>
    %c7 = arith.constant 7 : index
    %75 = memref.load %arg0[%c7] : memref<44xf32, #tpu.memory_space<smem>>
    %76 = arith.extui %2 : vector<1x256xi1> to vector<1x256xi32>
    %77 = arith.sitofp %76 : vector<1x256xi32> to vector<1x256xf32>
    %78 = vector.broadcast %75 : f32 to vector<1x256xf32>
    %79 = arith.mulf %77, %78 : vector<1x256xf32>
    %80 = vector.broadcast %79 : vector<1x256xf32> to vector<2x256xf32>
    %81 = arith.mulf %74, %80 : vector<2x256xf32>
    %82 = arith.addf %73, %81 : vector<2x256xf32>
    %c15_i32 = arith.constant 15 : i32
    %83 = tpu.dynamic_rotate %60 by %c15_i32 dim 1 : vector<2x256xf32>, i32 -> vector<2x256xf32>
    %c8 = arith.constant 8 : index
    %84 = memref.load %arg0[%c8] : memref<44xf32, #tpu.memory_space<smem>>
    %85 = arith.andi %2, %14 : vector<1x256xi1>
    %86 = arith.extui %85 : vector<1x256xi1> to vector<1x256xi32>
    %87 = arith.sitofp %86 : vector<1x256xi32> to vector<1x256xf32>
    %88 = vector.broadcast %84 : f32 to vector<1x256xf32>
    %89 = arith.mulf %87, %88 : vector<1x256xf32>
    %90 = vector.broadcast %89 : vector<1x256xf32> to vector<2x256xf32>
    %91 = arith.mulf %83, %90 : vector<2x256xf32>
    %92 = arith.addf %82, %91 : vector<2x256xf32>
    %c1_i32_12 = arith.constant 1 : i32
    %93 = tpu.dynamic_rotate %60 by %c1_i32_12 dim 1 : vector<2x256xf32>, i32 -> vector<2x256xf32>
    %c9 = arith.constant 9 : index
    %94 = memref.load %arg0[%c9] : memref<44xf32, #tpu.memory_space<smem>>
    %95 = arith.extui %10 : vector<1x256xi1> to vector<1x256xi32>
    %96 = arith.sitofp %95 : vector<1x256xi32> to vector<1x256xf32>
    %97 = vector.broadcast %94 : f32 to vector<1x256xf32>
    %98 = arith.mulf %96, %97 : vector<1x256xf32>
    %99 = vector.broadcast %98 : vector<1x256xf32> to vector<2x256xf32>
    %100 = arith.mulf %93, %99 : vector<2x256xf32>
    %101 = arith.addf %92, %100 : vector<2x256xf32>
    %c255_i32 = arith.constant 255 : i32
    %102 = tpu.dynamic_rotate %60 by %c255_i32 dim 1 : vector<2x256xf32>, i32 -> vector<2x256xf32>
    %c11 = arith.constant 11 : index
    %103 = memref.load %arg0[%c11] : memref<44xf32, #tpu.memory_space<smem>>
    %104 = arith.extui %14 : vector<1x256xi1> to vector<1x256xi32>
    %105 = arith.sitofp %104 : vector<1x256xi32> to vector<1x256xf32>
    %106 = vector.broadcast %103 : f32 to vector<1x256xf32>
    %107 = arith.mulf %105, %106 : vector<1x256xf32>
    %108 = vector.broadcast %107 : vector<1x256xf32> to vector<2x256xf32>
    %109 = arith.mulf %102, %108 : vector<2x256xf32>
    %110 = arith.addf %101, %109 : vector<2x256xf32>
    %c241_i32 = arith.constant 241 : i32
    %111 = tpu.dynamic_rotate %60 by %c241_i32 dim 1 : vector<2x256xf32>, i32 -> vector<2x256xf32>
    %c12 = arith.constant 12 : index
    %112 = memref.load %arg0[%c12] : memref<44xf32, #tpu.memory_space<smem>>
    %113 = arith.andi %4, %10 : vector<1x256xi1>
    %114 = arith.extui %113 : vector<1x256xi1> to vector<1x256xi32>
    %115 = arith.sitofp %114 : vector<1x256xi32> to vector<1x256xf32>
    %116 = vector.broadcast %112 : f32 to vector<1x256xf32>
    %117 = arith.mulf %115, %116 : vector<1x256xf32>
    %118 = vector.broadcast %117 : vector<1x256xf32> to vector<2x256xf32>
    %119 = arith.mulf %111, %118 : vector<2x256xf32>
    %120 = arith.addf %110, %119 : vector<2x256xf32>
    %c240_i32_13 = arith.constant 240 : i32
    %121 = tpu.dynamic_rotate %60 by %c240_i32_13 dim 1 : vector<2x256xf32>, i32 -> vector<2x256xf32>
    %c13 = arith.constant 13 : index
    %122 = memref.load %arg0[%c13] : memref<44xf32, #tpu.memory_space<smem>>
    %123 = arith.extui %4 : vector<1x256xi1> to vector<1x256xi32>
    %124 = arith.sitofp %123 : vector<1x256xi32> to vector<1x256xf32>
    %125 = vector.broadcast %122 : f32 to vector<1x256xf32>
    %126 = arith.mulf %124, %125 : vector<1x256xf32>
    %127 = vector.broadcast %126 : vector<1x256xf32> to vector<2x256xf32>
    %128 = arith.mulf %121, %127 : vector<2x256xf32>
    %129 = arith.addf %120, %128 : vector<2x256xf32>
    %c239_i32 = arith.constant 239 : i32
    %130 = tpu.dynamic_rotate %60 by %c239_i32 dim 1 : vector<2x256xf32>, i32 -> vector<2x256xf32>
    %c14 = arith.constant 14 : index
    %131 = memref.load %arg0[%c14] : memref<44xf32, #tpu.memory_space<smem>>
    %132 = arith.andi %4, %14 : vector<1x256xi1>
    %133 = arith.extui %132 : vector<1x256xi1> to vector<1x256xi32>
    %134 = arith.sitofp %133 : vector<1x256xi32> to vector<1x256xf32>
    %135 = vector.broadcast %131 : f32 to vector<1x256xf32>
    %136 = arith.mulf %134, %135 : vector<1x256xf32>
    %137 = vector.broadcast %136 : vector<1x256xf32> to vector<2x256xf32>
    %138 = arith.mulf %130, %137 : vector<2x256xf32>
    %139 = arith.addf %129, %138 : vector<2x256xf32>
    %c15 = arith.constant 15 : index
    %140 = memref.load %arg0[%c15] : memref<44xf32, #tpu.memory_space<smem>>
    %141 = vector.broadcast %140 : f32 to vector<2x256xf32>
    %142 = arith.addf %139, %141 : vector<2x256xf32>
    %143 = arith.mulf %142, %142 : vector<2x256xf32>
    %144 = vector.shape_cast %142 : vector<2x256xf32> to vector<1x2x256xf32>
    %145 = vector.shape_cast %143 : vector<2x256xf32> to vector<1x2x256xf32>
    %146 = tpu.concatenate %144, %145 in 0 : vector<1x2x256xf32>, vector<1x2x256xf32> -> vector<2x2x256xf32>
    %cst_14 = arith.constant dense<0.000000e+00> : vector<2x2xf32>
    %147 = vector.multi_reduction <add>, %146, %cst_14 [2] : vector<2x2x256xf32> to vector<2x2xf32>
    %cst_15 = arith.constant dense<0.000000e+00> : vector<2xf32>
    %148 = vector.multi_reduction <add>, %147, %cst_15 [1] : vector<2x2xf32> to vector<2xf32>
    %149 = vector.shape_cast %148 : vector<2xf32> to vector<2x1xf32>
    %150 = vector.extract_strided_slice %149 {offsets = [0, 0], sizes = [1, 1], strides = [1, 1]} : vector<2x1xf32> to vector<1x1xf32>
    %cst_16 = arith.constant 0.001953125 : f32
    %151 = vector.broadcast %cst_16 : f32 to vector<1x1xf32>
    %152 = arith.mulf %150, %151 : vector<1x1xf32>
    %153 = vector.extract_strided_slice %149 {offsets = [1, 0], sizes = [1, 1], strides = [1, 1]} : vector<2x1xf32> to vector<1x1xf32>
    %cst_17 = arith.constant 0.001953125 : f32
    %154 = vector.broadcast %cst_17 : f32 to vector<1x1xf32>
    %155 = arith.mulf %153, %154 : vector<1x1xf32>
    %156 = arith.mulf %152, %152 : vector<1x1xf32>
    %157 = arith.subf %155, %156 : vector<1x1xf32>
    %cst_18 = arith.constant 0.000000e+00 : f32
    %158 = vector.broadcast %cst_18 : f32 to vector<1x1xf32>
    %159 = arith.maximumf %157, %158 : vector<1x1xf32>
    %cst_19 = arith.constant 9.99999974E-6 : f32
    %160 = vector.broadcast %cst_19 : f32 to vector<1x1xf32>
    %161 = arith.addf %159, %160 : vector<1x1xf32>
    %162 = math.rsqrt %161 : vector<1x1xf32>
    %c16 = arith.constant 16 : index
    %163 = memref.load %arg0[%c16] : memref<44xf32, #tpu.memory_space<smem>>
    %164 = vector.broadcast %163 : f32 to vector<1x1xf32>
    %165 = arith.mulf %162, %164 : vector<1x1xf32>
    %c17 = arith.constant 17 : index
    %166 = memref.load %arg0[%c17] : memref<44xf32, #tpu.memory_space<smem>>
    %167 = arith.mulf %152, %165 : vector<1x1xf32>
    %168 = vector.broadcast %166 : f32 to vector<1x1xf32>
    %169 = arith.subf %168, %167 : vector<1x1xf32>
    %170 = vector.broadcast %165 : vector<1x1xf32> to vector<2x256xf32>
    %171 = arith.mulf %142, %170 : vector<2x256xf32>
    %172 = vector.broadcast %169 : vector<1x1xf32> to vector<2x256xf32>
    %173 = arith.addf %171, %172 : vector<2x256xf32>
    %cst_20 = arith.constant 0.000000e+00 : f32
    %174 = vector.broadcast %cst_20 : f32 to vector<2x256xf32>
    %175 = arith.maximumf %173, %174 : vector<2x256xf32>
    %c18 = arith.constant 18 : index
    %176 = memref.load %arg0[%c18] : memref<44xf32, #tpu.memory_space<smem>>
    %177 = vector.broadcast %176 : f32 to vector<2x256xf32>
    %178 = arith.mulf %175, %177 : vector<2x256xf32>
    %c19 = arith.constant 19 : index
    %179 = memref.load %arg0[%c19] : memref<44xf32, #tpu.memory_space<smem>>
    %180 = vector.broadcast %179 : f32 to vector<2x256xf32>
    %181 = arith.addf %178, %180 : vector<2x256xf32>
    %cst_21 = arith.constant 5.000000e-01 : f32
    %182 = vector.broadcast %cst_21 : f32 to vector<2x256xf32>
    %183 = arith.mulf %182, %181 : vector<2x256xf32>
    %184 = math.tanh %183 : vector<2x256xf32>
    %cst_22 = arith.constant 5.000000e-01 : f32
    %185 = vector.broadcast %cst_22 : f32 to vector<2x256xf32>
    %186 = arith.mulf %185, %184 : vector<2x256xf32>
    %cst_23 = arith.constant 5.000000e-01 : f32
    %187 = vector.broadcast %cst_23 : f32 to vector<2x256xf32>
    %188 = arith.addf %186, %187 : vector<2x256xf32>
    %189 = arith.mulf %21, %188 : vector<2x256xf32>
    %c24 = arith.constant 24 : index
    %190 = memref.load %arg0[%c24] : memref<44xf32, #tpu.memory_space<smem>>
    %191 = vector.broadcast %190 : f32 to vector<2x256xf32>
    %192 = arith.mulf %189, %191 : vector<2x256xf32>
    %c17_i32_24 = arith.constant 17 : i32
    %193 = tpu.dynamic_rotate %189 by %c17_i32_24 dim 1 : vector<2x256xf32>, i32 -> vector<2x256xf32>
    %c20 = arith.constant 20 : index
    %194 = memref.load %arg0[%c20] : memref<44xf32, #tpu.memory_space<smem>>
    %195 = arith.andi %2, %10 : vector<1x256xi1>
    %196 = arith.extui %195 : vector<1x256xi1> to vector<1x256xi32>
    %197 = arith.sitofp %196 : vector<1x256xi32> to vector<1x256xf32>
    %198 = vector.broadcast %194 : f32 to vector<1x256xf32>
    %199 = arith.mulf %197, %198 : vector<1x256xf32>
    %200 = vector.broadcast %199 : vector<1x256xf32> to vector<2x256xf32>
    %201 = arith.mulf %193, %200 : vector<2x256xf32>
    %202 = arith.addf %192, %201 : vector<2x256xf32>
    %c16_i32_25 = arith.constant 16 : i32
    %203 = tpu.dynamic_rotate %189 by %c16_i32_25 dim 1 : vector<2x256xf32>, i32 -> vector<2x256xf32>
    %c21 = arith.constant 21 : index
    %204 = memref.load %arg0[%c21] : memref<44xf32, #tpu.memory_space<smem>>
    %205 = arith.extui %2 : vector<1x256xi1> to vector<1x256xi32>
    %206 = arith.sitofp %205 : vector<1x256xi32> to vector<1x256xf32>
    %207 = vector.broadcast %204 : f32 to vector<1x256xf32>
    %208 = arith.mulf %206, %207 : vector<1x256xf32>
    %209 = vector.broadcast %208 : vector<1x256xf32> to vector<2x256xf32>
    %210 = arith.mulf %203, %209 : vector<2x256xf32>
    %211 = arith.addf %202, %210 : vector<2x256xf32>
    %c15_i32_26 = arith.constant 15 : i32
    %212 = tpu.dynamic_rotate %189 by %c15_i32_26 dim 1 : vector<2x256xf32>, i32 -> vector<2x256xf32>
    %c22 = arith.constant 22 : index
    %213 = memref.load %arg0[%c22] : memref<44xf32, #tpu.memory_space<smem>>
    %214 = arith.andi %2, %14 : vector<1x256xi1>
    %215 = arith.extui %214 : vector<1x256xi1> to vector<1x256xi32>
    %216 = arith.sitofp %215 : vector<1x256xi32> to vector<1x256xf32>
    %217 = vector.broadcast %213 : f32 to vector<1x256xf32>
    %218 = arith.mulf %216, %217 : vector<1x256xf32>
    %219 = vector.broadcast %218 : vector<1x256xf32> to vector<2x256xf32>
    %220 = arith.mulf %212, %219 : vector<2x256xf32>
    %221 = arith.addf %211, %220 : vector<2x256xf32>
    %c1_i32_27 = arith.constant 1 : i32
    %222 = tpu.dynamic_rotate %189 by %c1_i32_27 dim 1 : vector<2x256xf32>, i32 -> vector<2x256xf32>
    %c23 = arith.constant 23 : index
    %223 = memref.load %arg0[%c23] : memref<44xf32, #tpu.memory_space<smem>>
    %224 = arith.extui %10 : vector<1x256xi1> to vector<1x256xi32>
    %225 = arith.sitofp %224 : vector<1x256xi32> to vector<1x256xf32>
    %226 = vector.broadcast %223 : f32 to vector<1x256xf32>
    %227 = arith.mulf %225, %226 : vector<1x256xf32>
    %228 = vector.broadcast %227 : vector<1x256xf32> to vector<2x256xf32>
    %229 = arith.mulf %222, %228 : vector<2x256xf32>
    %230 = arith.addf %221, %229 : vector<2x256xf32>
    %c255_i32_28 = arith.constant 255 : i32
    %231 = tpu.dynamic_rotate %189 by %c255_i32_28 dim 1 : vector<2x256xf32>, i32 -> vector<2x256xf32>
    %c25 = arith.constant 25 : index
    %232 = memref.load %arg0[%c25] : memref<44xf32, #tpu.memory_space<smem>>
    %233 = arith.extui %14 : vector<1x256xi1> to vector<1x256xi32>
    %234 = arith.sitofp %233 : vector<1x256xi32> to vector<1x256xf32>
    %235 = vector.broadcast %232 : f32 to vector<1x256xf32>
    %236 = arith.mulf %234, %235 : vector<1x256xf32>
    %237 = vector.broadcast %236 : vector<1x256xf32> to vector<2x256xf32>
    %238 = arith.mulf %231, %237 : vector<2x256xf32>
    %239 = arith.addf %230, %238 : vector<2x256xf32>
    %c241_i32_29 = arith.constant 241 : i32
    %240 = tpu.dynamic_rotate %189 by %c241_i32_29 dim 1 : vector<2x256xf32>, i32 -> vector<2x256xf32>
    %c26 = arith.constant 26 : index
    %241 = memref.load %arg0[%c26] : memref<44xf32, #tpu.memory_space<smem>>
    %242 = arith.andi %4, %10 : vector<1x256xi1>
    %243 = arith.extui %242 : vector<1x256xi1> to vector<1x256xi32>
    %244 = arith.sitofp %243 : vector<1x256xi32> to vector<1x256xf32>
    %245 = vector.broadcast %241 : f32 to vector<1x256xf32>
    %246 = arith.mulf %244, %245 : vector<1x256xf32>
    %247 = vector.broadcast %246 : vector<1x256xf32> to vector<2x256xf32>
    %248 = arith.mulf %240, %247 : vector<2x256xf32>
    %249 = arith.addf %239, %248 : vector<2x256xf32>
    %c240_i32_30 = arith.constant 240 : i32
    %250 = tpu.dynamic_rotate %189 by %c240_i32_30 dim 1 : vector<2x256xf32>, i32 -> vector<2x256xf32>
    %c27 = arith.constant 27 : index
    %251 = memref.load %arg0[%c27] : memref<44xf32, #tpu.memory_space<smem>>
    %252 = arith.extui %4 : vector<1x256xi1> to vector<1x256xi32>
    %253 = arith.sitofp %252 : vector<1x256xi32> to vector<1x256xf32>
    %254 = vector.broadcast %251 : f32 to vector<1x256xf32>
    %255 = arith.mulf %253, %254 : vector<1x256xf32>
    %256 = vector.broadcast %255 : vector<1x256xf32> to vector<2x256xf32>
    %257 = arith.mulf %250, %256 : vector<2x256xf32>
    %258 = arith.addf %249, %257 : vector<2x256xf32>
    %c239_i32_31 = arith.constant 239 : i32
    %259 = tpu.dynamic_rotate %189 by %c239_i32_31 dim 1 : vector<2x256xf32>, i32 -> vector<2x256xf32>
    %c28 = arith.constant 28 : index
    %260 = memref.load %arg0[%c28] : memref<44xf32, #tpu.memory_space<smem>>
    %261 = arith.andi %4, %14 : vector<1x256xi1>
    %262 = arith.extui %261 : vector<1x256xi1> to vector<1x256xi32>
    %263 = arith.sitofp %262 : vector<1x256xi32> to vector<1x256xf32>
    %264 = vector.broadcast %260 : f32 to vector<1x256xf32>
    %265 = arith.mulf %263, %264 : vector<1x256xf32>
    %266 = vector.broadcast %265 : vector<1x256xf32> to vector<2x256xf32>
    %267 = arith.mulf %259, %266 : vector<2x256xf32>
    %268 = arith.addf %258, %267 : vector<2x256xf32>
    %c29 = arith.constant 29 : index
    %269 = memref.load %arg0[%c29] : memref<44xf32, #tpu.memory_space<smem>>
    %270 = vector.broadcast %269 : f32 to vector<2x256xf32>
    %271 = arith.addf %268, %270 : vector<2x256xf32>
    %272 = arith.mulf %271, %271 : vector<2x256xf32>
    %273 = vector.shape_cast %271 : vector<2x256xf32> to vector<1x2x256xf32>
    %274 = vector.shape_cast %272 : vector<2x256xf32> to vector<1x2x256xf32>
    %275 = tpu.concatenate %273, %274 in 0 : vector<1x2x256xf32>, vector<1x2x256xf32> -> vector<2x2x256xf32>
    %cst_32 = arith.constant dense<0.000000e+00> : vector<2x2xf32>
    %276 = vector.multi_reduction <add>, %275, %cst_32 [2] : vector<2x2x256xf32> to vector<2x2xf32>
    %cst_33 = arith.constant dense<0.000000e+00> : vector<2xf32>
    %277 = vector.multi_reduction <add>, %276, %cst_33 [1] : vector<2x2xf32> to vector<2xf32>
    %278 = vector.shape_cast %277 : vector<2xf32> to vector<2x1xf32>
    %279 = vector.extract_strided_slice %278 {offsets = [0, 0], sizes = [1, 1], strides = [1, 1]} : vector<2x1xf32> to vector<1x1xf32>
    %cst_34 = arith.constant 0.001953125 : f32
    %280 = vector.broadcast %cst_34 : f32 to vector<1x1xf32>
    %281 = arith.mulf %279, %280 : vector<1x1xf32>
    %282 = vector.extract_strided_slice %278 {offsets = [1, 0], sizes = [1, 1], strides = [1, 1]} : vector<2x1xf32> to vector<1x1xf32>
    %cst_35 = arith.constant 0.001953125 : f32
    %283 = vector.broadcast %cst_35 : f32 to vector<1x1xf32>
    %284 = arith.mulf %282, %283 : vector<1x1xf32>
    %285 = arith.mulf %281, %281 : vector<1x1xf32>
    %286 = arith.subf %284, %285 : vector<1x1xf32>
    %cst_36 = arith.constant 0.000000e+00 : f32
    %287 = vector.broadcast %cst_36 : f32 to vector<1x1xf32>
    %288 = arith.maximumf %286, %287 : vector<1x1xf32>
    %cst_37 = arith.constant 9.99999974E-6 : f32
    %289 = vector.broadcast %cst_37 : f32 to vector<1x1xf32>
    %290 = arith.addf %288, %289 : vector<1x1xf32>
    %291 = math.rsqrt %290 : vector<1x1xf32>
    %c30 = arith.constant 30 : index
    %292 = memref.load %arg0[%c30] : memref<44xf32, #tpu.memory_space<smem>>
    %293 = vector.broadcast %292 : f32 to vector<1x1xf32>
    %294 = arith.mulf %291, %293 : vector<1x1xf32>
    %c31 = arith.constant 31 : index
    %295 = memref.load %arg0[%c31] : memref<44xf32, #tpu.memory_space<smem>>
    %296 = arith.mulf %281, %294 : vector<1x1xf32>
    %297 = vector.broadcast %295 : f32 to vector<1x1xf32>
    %298 = arith.subf %297, %296 : vector<1x1xf32>
    %299 = vector.broadcast %294 : vector<1x1xf32> to vector<2x256xf32>
    %300 = arith.mulf %271, %299 : vector<2x256xf32>
    %301 = vector.broadcast %298 : vector<1x1xf32> to vector<2x256xf32>
    %302 = arith.addf %300, %301 : vector<2x256xf32>
    %cst_38 = arith.constant 0.000000e+00 : f32
    %303 = vector.broadcast %cst_38 : f32 to vector<2x256xf32>
    %304 = arith.maximumf %302, %303 : vector<2x256xf32>
    %c36 = arith.constant 36 : index
    %305 = memref.load %arg0[%c36] : memref<44xf32, #tpu.memory_space<smem>>
    %306 = vector.broadcast %305 : f32 to vector<2x256xf32>
    %307 = arith.mulf %304, %306 : vector<2x256xf32>
    %c17_i32_39 = arith.constant 17 : i32
    %308 = tpu.dynamic_rotate %304 by %c17_i32_39 dim 1 : vector<2x256xf32>, i32 -> vector<2x256xf32>
    %c32 = arith.constant 32 : index
    %309 = memref.load %arg0[%c32] : memref<44xf32, #tpu.memory_space<smem>>
    %310 = arith.andi %2, %10 : vector<1x256xi1>
    %311 = arith.extui %310 : vector<1x256xi1> to vector<1x256xi32>
    %312 = arith.sitofp %311 : vector<1x256xi32> to vector<1x256xf32>
    %313 = vector.broadcast %309 : f32 to vector<1x256xf32>
    %314 = arith.mulf %312, %313 : vector<1x256xf32>
    %315 = vector.broadcast %314 : vector<1x256xf32> to vector<2x256xf32>
    %316 = arith.mulf %308, %315 : vector<2x256xf32>
    %317 = arith.addf %307, %316 : vector<2x256xf32>
    %c16_i32_40 = arith.constant 16 : i32
    %318 = tpu.dynamic_rotate %304 by %c16_i32_40 dim 1 : vector<2x256xf32>, i32 -> vector<2x256xf32>
    %c33 = arith.constant 33 : index
    %319 = memref.load %arg0[%c33] : memref<44xf32, #tpu.memory_space<smem>>
    %320 = arith.extui %2 : vector<1x256xi1> to vector<1x256xi32>
    %321 = arith.sitofp %320 : vector<1x256xi32> to vector<1x256xf32>
    %322 = vector.broadcast %319 : f32 to vector<1x256xf32>
    %323 = arith.mulf %321, %322 : vector<1x256xf32>
    %324 = vector.broadcast %323 : vector<1x256xf32> to vector<2x256xf32>
    %325 = arith.mulf %318, %324 : vector<2x256xf32>
    %326 = arith.addf %317, %325 : vector<2x256xf32>
    %c15_i32_41 = arith.constant 15 : i32
    %327 = tpu.dynamic_rotate %304 by %c15_i32_41 dim 1 : vector<2x256xf32>, i32 -> vector<2x256xf32>
    %c34 = arith.constant 34 : index
    %328 = memref.load %arg0[%c34] : memref<44xf32, #tpu.memory_space<smem>>
    %329 = arith.andi %2, %14 : vector<1x256xi1>
    %330 = arith.extui %329 : vector<1x256xi1> to vector<1x256xi32>
    %331 = arith.sitofp %330 : vector<1x256xi32> to vector<1x256xf32>
    %332 = vector.broadcast %328 : f32 to vector<1x256xf32>
    %333 = arith.mulf %331, %332 : vector<1x256xf32>
    %334 = vector.broadcast %333 : vector<1x256xf32> to vector<2x256xf32>
    %335 = arith.mulf %327, %334 : vector<2x256xf32>
    %336 = arith.addf %326, %335 : vector<2x256xf32>
    %c1_i32_42 = arith.constant 1 : i32
    %337 = tpu.dynamic_rotate %304 by %c1_i32_42 dim 1 : vector<2x256xf32>, i32 -> vector<2x256xf32>
    %c35 = arith.constant 35 : index
    %338 = memref.load %arg0[%c35] : memref<44xf32, #tpu.memory_space<smem>>
    %339 = arith.extui %10 : vector<1x256xi1> to vector<1x256xi32>
    %340 = arith.sitofp %339 : vector<1x256xi32> to vector<1x256xf32>
    %341 = vector.broadcast %338 : f32 to vector<1x256xf32>
    %342 = arith.mulf %340, %341 : vector<1x256xf32>
    %343 = vector.broadcast %342 : vector<1x256xf32> to vector<2x256xf32>
    %344 = arith.mulf %337, %343 : vector<2x256xf32>
    %345 = arith.addf %336, %344 : vector<2x256xf32>
    %c255_i32_43 = arith.constant 255 : i32
    %346 = tpu.dynamic_rotate %304 by %c255_i32_43 dim 1 : vector<2x256xf32>, i32 -> vector<2x256xf32>
    %c37 = arith.constant 37 : index
    %347 = memref.load %arg0[%c37] : memref<44xf32, #tpu.memory_space<smem>>
    %348 = arith.extui %14 : vector<1x256xi1> to vector<1x256xi32>
    %349 = arith.sitofp %348 : vector<1x256xi32> to vector<1x256xf32>
    %350 = vector.broadcast %347 : f32 to vector<1x256xf32>
    %351 = arith.mulf %349, %350 : vector<1x256xf32>
    %352 = vector.broadcast %351 : vector<1x256xf32> to vector<2x256xf32>
    %353 = arith.mulf %346, %352 : vector<2x256xf32>
    %354 = arith.addf %345, %353 : vector<2x256xf32>
    %c241_i32_44 = arith.constant 241 : i32
    %355 = tpu.dynamic_rotate %304 by %c241_i32_44 dim 1 : vector<2x256xf32>, i32 -> vector<2x256xf32>
    %c38 = arith.constant 38 : index
    %356 = memref.load %arg0[%c38] : memref<44xf32, #tpu.memory_space<smem>>
    %357 = arith.andi %4, %10 : vector<1x256xi1>
    %358 = arith.extui %357 : vector<1x256xi1> to vector<1x256xi32>
    %359 = arith.sitofp %358 : vector<1x256xi32> to vector<1x256xf32>
    %360 = vector.broadcast %356 : f32 to vector<1x256xf32>
    %361 = arith.mulf %359, %360 : vector<1x256xf32>
    %362 = vector.broadcast %361 : vector<1x256xf32> to vector<2x256xf32>
    %363 = arith.mulf %355, %362 : vector<2x256xf32>
    %364 = arith.addf %354, %363 : vector<2x256xf32>
    %c240_i32_45 = arith.constant 240 : i32
    %365 = tpu.dynamic_rotate %304 by %c240_i32_45 dim 1 : vector<2x256xf32>, i32 -> vector<2x256xf32>
    %c39 = arith.constant 39 : index
    %366 = memref.load %arg0[%c39] : memref<44xf32, #tpu.memory_space<smem>>
    %367 = arith.extui %4 : vector<1x256xi1> to vector<1x256xi32>
    %368 = arith.sitofp %367 : vector<1x256xi32> to vector<1x256xf32>
    %369 = vector.broadcast %366 : f32 to vector<1x256xf32>
    %370 = arith.mulf %368, %369 : vector<1x256xf32>
    %371 = vector.broadcast %370 : vector<1x256xf32> to vector<2x256xf32>
    %372 = arith.mulf %365, %371 : vector<2x256xf32>
    %373 = arith.addf %364, %372 : vector<2x256xf32>
    %c239_i32_46 = arith.constant 239 : i32
    %374 = tpu.dynamic_rotate %304 by %c239_i32_46 dim 1 : vector<2x256xf32>, i32 -> vector<2x256xf32>
    %c40 = arith.constant 40 : index
    %375 = memref.load %arg0[%c40] : memref<44xf32, #tpu.memory_space<smem>>
    %376 = arith.andi %4, %14 : vector<1x256xi1>
    %377 = arith.extui %376 : vector<1x256xi1> to vector<1x256xi32>
    %378 = arith.sitofp %377 : vector<1x256xi32> to vector<1x256xf32>
    %379 = vector.broadcast %375 : f32 to vector<1x256xf32>
    %380 = arith.mulf %378, %379 : vector<1x256xf32>
    %381 = vector.broadcast %380 : vector<1x256xf32> to vector<2x256xf32>
    %382 = arith.mulf %374, %381 : vector<2x256xf32>
    %383 = arith.addf %373, %382 : vector<2x256xf32>
    %c41 = arith.constant 41 : index
    %384 = memref.load %arg0[%c41] : memref<44xf32, #tpu.memory_space<smem>>
    %385 = vector.broadcast %384 : f32 to vector<2x256xf32>
    %386 = arith.addf %383, %385 : vector<2x256xf32>
    %387 = arith.mulf %386, %386 : vector<2x256xf32>
    %388 = vector.shape_cast %386 : vector<2x256xf32> to vector<1x2x256xf32>
    %389 = vector.shape_cast %387 : vector<2x256xf32> to vector<1x2x256xf32>
    %390 = tpu.concatenate %388, %389 in 0 : vector<1x2x256xf32>, vector<1x2x256xf32> -> vector<2x2x256xf32>
    %cst_47 = arith.constant dense<0.000000e+00> : vector<2x2xf32>
    %391 = vector.multi_reduction <add>, %390, %cst_47 [2] : vector<2x2x256xf32> to vector<2x2xf32>
    %cst_48 = arith.constant dense<0.000000e+00> : vector<2xf32>
    %392 = vector.multi_reduction <add>, %391, %cst_48 [1] : vector<2x2xf32> to vector<2xf32>
    %393 = vector.shape_cast %392 : vector<2xf32> to vector<2x1xf32>
    %394 = vector.extract_strided_slice %393 {offsets = [0, 0], sizes = [1, 1], strides = [1, 1]} : vector<2x1xf32> to vector<1x1xf32>
    %cst_49 = arith.constant 0.001953125 : f32
    %395 = vector.broadcast %cst_49 : f32 to vector<1x1xf32>
    %396 = arith.mulf %394, %395 : vector<1x1xf32>
    %397 = vector.extract_strided_slice %393 {offsets = [1, 0], sizes = [1, 1], strides = [1, 1]} : vector<2x1xf32> to vector<1x1xf32>
    %cst_50 = arith.constant 0.001953125 : f32
    %398 = vector.broadcast %cst_50 : f32 to vector<1x1xf32>
    %399 = arith.mulf %397, %398 : vector<1x1xf32>
    %400 = arith.mulf %396, %396 : vector<1x1xf32>
    %401 = arith.subf %399, %400 : vector<1x1xf32>
    %cst_51 = arith.constant 0.000000e+00 : f32
    %402 = vector.broadcast %cst_51 : f32 to vector<1x1xf32>
    %403 = arith.maximumf %401, %402 : vector<1x1xf32>
    %cst_52 = arith.constant 9.99999974E-6 : f32
    %404 = vector.broadcast %cst_52 : f32 to vector<1x1xf32>
    %405 = arith.addf %403, %404 : vector<1x1xf32>
    %406 = math.rsqrt %405 : vector<1x1xf32>
    %c42 = arith.constant 42 : index
    %407 = memref.load %arg0[%c42] : memref<44xf32, #tpu.memory_space<smem>>
    %408 = vector.broadcast %407 : f32 to vector<1x1xf32>
    %409 = arith.mulf %406, %408 : vector<1x1xf32>
    %c43 = arith.constant 43 : index
    %410 = memref.load %arg0[%c43] : memref<44xf32, #tpu.memory_space<smem>>
    %411 = arith.mulf %396, %409 : vector<1x1xf32>
    %412 = vector.broadcast %410 : f32 to vector<1x1xf32>
    %413 = arith.subf %412, %411 : vector<1x1xf32>
    %414 = vector.broadcast %409 : vector<1x1xf32> to vector<2x256xf32>
    %415 = arith.mulf %386, %414 : vector<2x256xf32>
    %416 = vector.broadcast %413 : vector<1x1xf32> to vector<2x256xf32>
    %417 = arith.addf %415, %416 : vector<2x256xf32>
    %418 = arith.addf %189, %417 : vector<2x256xf32>
    %cst_53 = arith.constant 0.000000e+00 : f32
    %419 = vector.broadcast %cst_53 : f32 to vector<2x256xf32>
    %420 = arith.maximumf %418, %419 : vector<2x256xf32>
    %421 = arith.addf %420, %420 : vector<2x256xf32>
    %c0_54 = arith.constant 0 : index
    %c0_55 = arith.constant 0 : index
    %422 = vector.load %arg3[%c0_54, %c0_55] : memref<2x256xf32, #tpu.memory_space<vmem>>, vector<2x256xf32>
    tpu.vector_store %arg3[%c0_54, %c0_55], %421 {strides = array<i32>} : memref<2x256xf32, #tpu.memory_space<vmem>>, vector<2x256xf32>,
    return
  }
}

</mosaic_0001>

<bundles_post_ra>
// kernel: edge_forward.1
= control target key start
LH: loop header
LB: loop body
LE: loop exit
PB: predicated region body
PF: predicated region fallthrough
CT: control target
= control target key end

     0   :  { %8 = vsyncpa [#allocation3], 0  ;;  %s1150_s15 = smov [#allocation2]   ;;  %s1648_s0 = inlined_call_operand.vmem [shape: f32[44], index: 0, kind: input, shape index: {}]   ;;  %s1649_s1 = inlined_call_operand.vmem [shape: s8[1,256], index: 1, kind: input, shape index: {}]   ;;  %s1650_s2 = inlined_call_operand.vmem [shape: f32[2,256], index: 2, kind: input, shape index: {}, may-alias: {2,3}]   ;;  %s1651_s3 = inlined_call_operand.vmem [shape: f32[2,256], index: 3, kind: output, shape index: {}, may-alias: {2,3}]  }
   0x1   :  { %s14_s14 = sshll.u32 %s1648_s0, 4  ;;  %s15_s14 = int_to_ptr.vmem [resolvable:$true] %s14_s14 }
   0x2   :  { %17 = dma.vmem_to_smem %s15_s14, 16, %s1150_s15, [#allocation3]  }
   0x3   :  { %1148 = dma.done.wait [#allocation3], 16  }
   0x4   :  { %1149 = vsyncadd [#allocation3], 4294967280 }
   0x5   :  { %26 = sfence }
   0x6   :  { %s41_s16 = sld [smem:[#allocation2]]  ;;  %v40_v0 = vld [vmem:[%s1650_s2] sm:$0xf]  ;;  %vm67_vm0 = vcmask 1041408   ;;  %v27_v21 = vlaneseq  ;;  %vm82_vm1 = vcmask 1041409   ;;  %vm85_vm2 = vcmask 9216  }
   0x7   :  { %s1044_s17 = sld [smem:[#allocation2 + $0x1]]  ;;  %s1151_s24 = smov 17  }
   0x8   :  { %s1045_s18 = sld [smem:[#allocation2 + $0x2]]  ;;  %v1194_v22 = vand.u32 127, %v27_v21  ;;  %s1152_s25 = smov 16  }
   0x9   :  { %s1046_s19 = sld [smem:[#allocation2 + $0x3]]  ;;  %s1153_s26 = smov 15  }
   0xa   :  { %s1047_s0 = sld [smem:[#allocation2 + $0x4]]  ;;  %s1154_s27 = smov 1   ;;  %vm30_vm10 = vcmp.ge.s32.totalorder %v1194_v22, 16  ;;  %vm140_vm15 = vcmp.lt.s32.totalorder %v1194_v22, 17 }
   0xb   :  { %s1048_s2 = sld [smem:[#allocation2 + $0x5]]  ;;  %s1155_s28 = smov 127  }
   0xc   :  { %v42_v1 = vstv %s41_s16  ;;  %s1156_s29 = smov 113   ;;  %s1157_s30 = smov 112  }
   0xd   :  { %v43_v2 = vmul.f32 %v42_v1, %v40_v0  ;;  %v45_v3 = vstv %s1044_s17  ;;  %s1158_s4 = smov 111   ;;  %s1236_s7 = sld [smem:[#allocation2 + $0x6]] }
   0xe   :  { %v48_v4 = vstv %s1045_s18  ;;  %s1252_s8 = sld [smem:[#allocation2 + $0x9]] }
   0xf   :  { %v1187_v5 = vadd.f32 %v45_v3, %v43_v2  ;;  %v51_v6 = vstv %s1046_s19  ;;  %s1254_s9 = sld [smem:[#allocation2 + $0xb]] }
  0x10   :  { %v108_v41 = vstv %s1047_s0  ;;  %s1270_s10 = sld [smem:[#allocation2 + $0xa]] }
  0x11   :  { %v49_v7 = vmul.f32 %v48_v4, %v1187_v5  ;;  %v115_v45 = vstv %s1048_s2  ;;  %s1290_s11 = sld [smem:[#allocation2 + $0x7]] }
  0x12   :  { %s1303_s12 = sld [smem:[#allocation2 + $0xc]] }
  0x13   :  { %v52_v8 = vadd.f32 %v51_v6, %v49_v7  ;;  %s1344_s13 = sld [smem:[#allocation2 + $0xd]] }
  0x14   :  { %s1362_s14 = sld [smem:[#allocation2 + $0xe]] }
  0x15   :  { %56 = vst [vmem:[#allocation1] ss:$4 sm:$0xff] %v52_v8  ;;  %v53_v9 = vmul.f32 %v52_v8, %v52_v8  ;;  %s1070_s15 = sld [smem:[#allocation2 + $0xf]] }
  0x16   :  { %s1071_s16 = sld [smem:[#allocation2 + $0x10]] }
  0x17   :  { %60 = vst [vmem:[#allocation1 + $0x20] ss:$4 sm:$0xff] %v53_v9  ;;  %s1072_s17 = sld [smem:[#allocation2 + $0x11]] }
  0x18   :  { %s1073_s18 = sld [smem:[#allocation2 + $0x12]] }
  0x19   :  { %s1074_s20 = sld [smem:[#allocation2 + $0x13]] }
  0x1a   :  { %s1076_s0 = sld [smem:[#allocation2 + $0x14]] }
  0x1b   :  { %s1079_s2 = sld [smem:[#allocation2 + $0x17]] }
  0x1c   :  { %v57_v10 = vld.sshfl [vmem:[#allocation1] sm:$0xff pattern:$0x73625140]  ;;  %v58_v11 = vld.sshfl [vmem:[#allocation1 + $0x8] sm:$0xff pattern:$0x73625140] }
  0x1d   :  { %v68_v12 = vsel %vm67_vm0, %v57_v10, 0.0  ;;  %v69_v13 = vsel %vm67_vm0, %v58_v11, 0.0  ;;  %s1075_s5 = sld [smem:[#allocation2 + $0x18]] }
  0x1e   :  { %v70_v14 = vadd.f32 %v69_v13, %v68_v12  ;;  %v61_v15 = vld.sshfl [vmem:[#allocation1 + $0x20] sm:$0xff pattern:$0x73625140]  ;;  %v62_v16 = vld.sshfl [vmem:[#allocation1 + $0x28] sm:$0xff pattern:$0x73625140] }
  0x1f   :  { %v73_v17 = vsel %vm67_vm0, %v61_v15, 0.0  ;;  %v74_v18 = vsel %vm67_vm0, %v62_v16, 0.0  ;;  %v1159_v13 = vmov 0   ;;  %s1473_s6 = sld [smem:[#allocation2 + $0x1a]] }
  0x20   :  { %71 = vadd.xlane.f32.xlu0 %v70_v14  ;;  %v75_v19 = vadd.f32 %v74_v18, %v73_v17 }
  0x28   :  { %76 = vadd.xlane.f32.xlu0 %v75_v19 }
  0x93   :  { %v72_v20 = vpop.xlane.xlu0 %71 }
  0x94   :  { %v80_v24 = vperm.slane %v72_v20, %v1194_v22 }
  0x9b   :  { %v77_v23 = vpop.xlane.xlu0 %76 }
  0x9c   :  { %v81_v25 = vperm.slane %v77_v23, %v1194_v22 }
  0x9e   :  { %v83_v26 = vsel %vm82_vm1, %v81_v25, %v80_v24  ;;  %v1160_v24 = vmov 0.0  }
  0x9f   :  { %v86_v27 = vsel %vm85_vm2, %v83_v26, 0.0  ;;  %v155_v26 = vstv %s1236_s7  ;;  %s1475_s7 = sld [smem:[#allocation2 + $0x15]] }
  0xa0   :  { %87 = vadd.xlane.f32.xlu1 %v86_v27 }
 0x113   :  { %v88_v28 = vpop.xlane.xlu1 %87 }
 0x114   :  { %v89_v29 = vmul.f32 0.001953125, %v88_v28 }
 0x116   :  { %v90_v30 = vmul.f32 %v89_v29, %v89_v29 }
 0x118   :  { %v92_v31 = vrot.slane %v90_v30, 7 }
 0x11a   :  { %v94_v32 = vsub.f32 %v89_v29, %v92_v31 }
 0x11c   :  { %v95_v33 = vmax.f32 %v94_v32, 0.0 }
 0x11e   :  { %v96_v34 = vadd.f32 1e-05, %v95_v33 }
 0x120   :  { %1126 = vrsqrt.f32 %v96_v34  ;;  %vm103_vm4 = vweird.f32 %v96_v34 }
 0x126   :  { %v1127_v35 = vpop.eup %1126 }
 0x127   :  { %v98_v36 = vmul.f32 %v1127_v35, %v96_v34  ;;  %vm104_vm3 = vweird.f32 %v1127_v35  ;;  %v1287_v34 = vadd.s32 128, %v1194_v22 }
 0x128   :  { %vm105_vm5 = vmor %vm103_vm4, %vm104_vm3  ;;  %vm177_vm4 = vcmp.lt.s32.totalorder %v1194_v22, 16 }
 0x129   :  { %v99_v37 = vmul.f32 %v1127_v35, %v98_v36  ;;  %vm33_vm3 = vcmp.lt.s32.totalorder %v1287_v34, 240 }
 0x12b   :  { %v100_v38 = vmul.f32 0.5, %v99_v37 }
 0x12d   :  { %v101_v39 = vsub.f32 1.5, %v100_v38  ;;  %v247_v38 = vstv %s1252_s8  ;;  %s1493_s8 = sld [smem:[#allocation2 + $0x1c]] }
 0x12f   :  { %v102_v40 = vmul.f32 %v1127_v35, %v101_v39 }
 0x131   :  { %v106_v42 = vsel %vm105_vm5, %v1127_v35, %v102_v40 }
 0x132   :  { %v109_v43 = vmul.f32 %v108_v41, %v106_v42 }
 0x134   :  { %v112_v44 = vrot.slane %v109_v43, 1  ;;  %v278_v43 = vstv %s1254_s9  ;;  %s1084_s9 = sld [smem:[#allocation2 + $0x1d]] }
 0x136   :  { %1099 = vpush %v112_v44  ;;  %v114_v46 = vmul.f32 %v112_v44, %v89_v29 }
 0x138   :  { %v116_v47 = vsub.f32 %v115_v45, %v114_v46 }
 0x13a   :  { %1101 = vpush %v116_v47 }
 0x167   :  { %s1100_s22 = spop %1099 }
 0x168   :  { %v118_v48 = vstv %s1100_s22  ;;  %s1078_s22 = sld [smem:[#allocation2 + $0x16]] }
 0x169   :  { %v120_v49 = vmul.f32 %v118_v48, %v52_v8  ;;  %v34_v8 = vld [vmem:[%s1649_s1] sm:$0x3]  ;;  %s1241_s1 = sld [smem:[#allocation2 + $0x8]] }
 0x16a   :  { %v35_v9 = vunpack.c.0.s8 %v34_v8 }
 0x16b   :  { %s1102_s23 = spop %1101 }
 0x16c   :  { %v123_v50 = vstv %s1102_s23  ;;  %v36_v11 = vand.u32 1, %v35_v9  ;;  %v38_v12 = vand.u32 2, %v35_v9  ;;  %s1080_s23 = sld [smem:[#allocation2 + $0x19]] }
 0x16d   :  { %v125_v51 = vadd.f32 %v123_v50, %v120_v49  ;;  %v128_v49 = vstv %s1270_s10  ;;  %s1085_s10 = sld [smem:[#allocation2 + $0x1e]] }
 0x16e   :  { %vm37_vm6 = vcmp.gt.s32.totalorder %v36_v11, 0  ;;  %vm39_vm7 = vcmp.gt.s32.totalorder %v38_v12, 0 }
 0x16f   :  { %v1200_v52 = vmax.f32 %v125_v51, 0.0  ;;  %v144_v14 = vsel %vm37_vm6, 1, %v1159_v13  ;;  %v209_v18 = vsel %vm39_vm7, 1, %v1159_v13  ;;  %v220_v36 = vstv %s1241_s1  ;;  %s1483_s1 = sld [smem:[#allocation2 + $0x1b]] }
 0x170   :  { %v145_v16 = vperm.slane %v144_v14, 0  ;;  %v146_v17 = vperm.slane %v144_v14, 4  ;;  %v210_v19 = vperm.slane %v209_v18, 0  ;;  %v211_v23 = vperm.slane %v209_v18, 4 }
 0x171   :  { %131 = vst [vmem:[#allocation1] ss:$4 sm:$0xff] %v1200_v52  ;;  %v1300_v37 = vsel %vm37_vm6, 1.0, %v1160_v24  ;;  %v1311_v42 = vsel %vm39_vm7, 1.0, %v1160_v24  ;;  %vm205_vm6 = vcmp.lt.s32.totalorder %v1194_v22, 15  ;;  %vm242_vm7 = vcmp.lt.s32.totalorder %v1194_v22, 1 }
 0x172   :  { %vm1243_vm8 = vcmp.ne.s32.totalorder %v145_v16, 0  ;;  %vm1247_vm9 = vcmp.ne.s32.totalorder %v146_v17, 0  ;;  %vm1266_vm12 = vcmp.ne.s32.totalorder %v210_v19, 0  ;;  %vm1272_vm13 = vcmp.ne.s32.totalorder %v211_v23, 0 }
 0x173   :  { %v1259_v25 = vsel %vm1247_vm9, 1.0, %v1160_v24  ;;  %vm149_vm11 = vmand %vm30_vm10, %vm1243_vm8  ;;  %v1295_v35 = vsel %vm1272_vm13, 1.0, %v1160_v24  ;;  %v248_v46 = vmul.f32 %v1300_v37, %v247_v38  ;;  %v1328_v51 = vmul.f32 %v1311_v42, %v278_v43 }
 0x174   :  { %v157_v32 = vmul.f32 %v1259_v25, %v155_v26  ;;  %v1280_v33 = vsel %vm149_vm11, 1.0, %v1160_v24  ;;  %vm214_vm14 = vmand %vm30_vm10, %vm1266_vm12  ;;  %v222_v45 = vmul.f32 %v1295_v35, %v220_v36  ;;  %vm336_vm11 = vcmp.lt.s32.totalorder %v1194_v22, 112 }
 0x175   :  { %v156_v39 = vmul.f32 %v1280_v33, %v155_v26  ;;  %v1307_v40 = vsel %vm214_vm14, 1.0, %v1160_v24  ;;  %vm309_vm5 = vmand %vm33_vm3, %vm1247_vm9  ;;  %vm273_vm9 = vcmp.lt.s32.totalorder %v1194_v22, 127 }
 0x176   :  { %v159_v41 = vperm.slane %v157_v32, 0  ;;  %v1325_v50 = vmul.f32 %v1307_v40, %v220_v36 }
 0x178   :  { %v132_v53 = vld.sshfl [vmem:[#allocation1] sm:$0xff pattern:$0x73625140]  ;;  %v133_v54 = vld.sshfl [vmem:[#allocation1 + $0x8] sm:$0xff pattern:$0x73625140] }
 0x179   :  { %168 = vst [vmem:[#allocation1] ss:$4 sm:$0xff] %v1200_v52  ;;  %138 = vrot.lane.b32.xlu2 %v133_v54, %s1151_s24  ;;  %136 = vrot.lane.b32.xlu1 %v132_v53, %s1151_s24  ;;  %v158_v53 = vperm.slane %v156_v39, 0  ;;  %v223_v9 = vperm.slane %v1325_v50, 0  ;;  %v344_v39 = vstv %s1344_s13 }
 0x180   :  { %v169_v55 = vld.sshfl [vmem:[#allocation1] sm:$0xff pattern:$0x73625140]  ;;  %v170_v56 = vld.sshfl [vmem:[#allocation1 + $0x8] sm:$0xff pattern:$0x73625140] }
 0x181   :  { %196 = vst [vmem:[#allocation1] ss:$4 sm:$0xff] %v1200_v52  ;;  %175 = vrot.lane.b32.xlu0 %v170_v56, %s1152_s25  ;;  %173 = vrot.lane.b32.xlu2 %v169_v55, %s1152_s25  ;;  %v224_v56 = vperm.slane %v222_v45, 0 }
 0x188   :  { %v197_v57 = vld.sshfl [vmem:[#allocation1] sm:$0xff pattern:$0x73625140]  ;;  %v198_v58 = vld.sshfl [vmem:[#allocation1 + $0x8] sm:$0xff pattern:$0x73625140] }
 0x189   :  { %233 = vst [vmem:[#allocation1] ss:$4 sm:$0xff] %v1200_v52  ;;  %201 = vrot.lane.b32.xlu2 %v197_v57, %s1153_s26  ;;  %v185_v57 = vstv %s1290_s11  ;;  %s1086_s11 = sld [smem:[#allocation2 + $0x1f]] }
 0x190   :  { %v234_v59 = vld.sshfl [vmem:[#allocation1] sm:$0xff pattern:$0x73625140]  ;;  %v235_v60 = vld.sshfl [vmem:[#allocation1 + $0x8] sm:$0xff pattern:$0x73625140] }
 0x191   :  { %264 = vst [vmem:[#allocation1] ss:$4 sm:$0xff] %v1200_v52  ;;  %203 = vrot.lane.b32.xlu2 %v198_v58, %s1153_s26  ;;  %240 = vrot.lane.b32.xlu1 %v235_v60, %s1154_s27  ;;  %v1342_v58 = vsel %vm30_vm10, 1.0, %v1160_v24  ;;  %v251_v60 = vperm.slane %v248_v46, 4  ;;  %vm304_vm10 = vcmp.lt.s32.totalorder %v1194_v22, 113 }
 0x192   :  { %v186_v11 = vmul.f32 %v1342_v58, %v185_v57 }
 0x193   :  { %v255_v12 = vperm.slane %v251_v60, 0 }
 0x198   :  { %v265_v61 = vld.sshfl [vmem:[#allocation1] sm:$0xff pattern:$0x73625140]  ;;  %v266_v62 = vld.sshfl [vmem:[#allocation1 + $0x8] sm:$0xff pattern:$0x73625140] }
 0x199   :  { %295 = vst [vmem:[#allocation1] ss:$4 sm:$0xff] %v1200_v52  ;;  %238 = vrot.lane.b32.xlu2 %v234_v59, %s1154_s27  ;;  %269 = vrot.lane.b32.xlu0 %v265_v61, %s1155_s28  ;;  %v250_v61 = vperm.slane %v248_v46, 0 }
 0x1a0   :  { %v297_v63 = vld.sshfl [vmem:[#allocation1 + $0x8] sm:$0xff pattern:$0x73625140]  ;;  %v296_v0 = vld.sshfl [vmem:[#allocation1] sm:$0xff pattern:$0x73625140] }
 0x1a1   :  { %271 = vrot.lane.b32.xlu2 %v266_v62, %s1155_s28  ;;  %302 = vrot.lane.b32.xlu0 %v297_v63, %s1156_s29  ;;  %327 = vst [vmem:[#allocation1] ss:$4 sm:$0xff] %v1200_v52  ;;  %v314_v62 = vstv %s1303_s12  ;;  %v1349_v63 = vsel %vm309_vm5, 1.0, %v1160_v24 }
 0x1a2   :  { %300 = vrot.lane.b32.xlu1 %v296_v0, %s1156_s29  ;;  %v316_v13 = vmul.f32 %v1349_v63, %v314_v62 }
 0x1a4   :  { %v318_v38 = vperm.slane %v316_v13, 0 }
 0x1a8   :  { %v329_v1 = vld.sshfl [vmem:[#allocation1 + $0x8] sm:$0xff pattern:$0x73625140]  ;;  %v328_v2 = vld.sshfl [vmem:[#allocation1] sm:$0xff pattern:$0x73625140] }
 0x1a9   :  { %332 = vrot.lane.b32.xlu2 %v328_v2, %s1157_s30  ;;  %355 = vst [vmem:[#allocation1] ss:$4 sm:$0xff] %v1200_v52 }
 0x1aa   :  { %334 = vrot.lane.b32.xlu1 %v329_v1, %s1157_s30 }
 0x1b0   :  { %v357_v3 = vld.sshfl [vmem:[#allocation1 + $0x8] sm:$0xff pattern:$0x73625140]  ;;  %v356_v4 = vld.sshfl [vmem:[#allocation1] sm:$0xff pattern:$0x73625140] }
 0x1b1   :  { %362 = vrot.lane.b32.xlu2 %v357_v3, %s1158_s4  ;;  %360 = vrot.lane.b32.xlu0 %v356_v4, %s1158_s4  ;;  %v282_v3 = vperm.slane %v1328_v51, 4  ;;  %v129_v4 = vmul.f32 %v128_v49, %v1200_v52  ;;  %v254_v52 = vperm.slane %v250_v61, 0 }
 0x1b3   :  { %v286_v21 = vperm.slane %v282_v3, 0 }
 0x1d3   :  { %v1226_v6 = vpop.permute.xlu2 %138 }
 0x1db   :  { %v1228_v7 = vpop.permute.xlu2 %173 }
 0x1e3   :  { %v1233_v10 = vpop.permute.xlu2 %201 }
 0x1eb   :  { %v1238_v15 = vpop.permute.xlu2 %203  ;;  %v137_v29 = vpop.permute.xlu1 %136 }
 0x1ec   :  { %v141_v44 = vsel %vm140_vm15, %v137_v29, %v1226_v6  ;;  %v142_v0 = vsel %vm140_vm15, %v1226_v6, %v137_v29  ;;  %v206_v1 = vsel %vm205_vm6, %v1233_v10, %v1238_v15  ;;  %v281_v29 = vperm.slane %v1328_v51, 0 }
 0x1ed   :  { %v161_v54 = vmul.f32 %v159_v41, %v141_v44  ;;  %v160_v14 = vmul.f32 %v158_v53, %v142_v0  ;;  %v226_v16 = vmul.f32 %v224_v56, %v206_v1  ;;  %v1387_v41 = vsel %vm33_vm3, 1.0, %v1160_v24 }
 0x1ee   :  { %v207_v20 = vsel %vm205_vm6, %v1238_v15, %v1233_v10  ;;  %v346_v34 = vmul.f32 %v1387_v41, %v344_v39  ;;  %v374_v10 = vstv %s1362_s14  ;;  %s1592_s14 = sld [smem:[#allocation2 + $0x28]] }
 0x1ef   :  { %v164_v8 = vrot.slane %v161_v54, 6  ;;  %v229_v43 = vrot.slane %v226_v16, 6  ;;  %v225_v53 = vmul.f32 %v223_v9, %v207_v20 }
 0x1f1   :  { %v165_v26 = vsel %vm67_vm0, %v160_v14, %v164_v8  ;;  %v230_v3 = vsel %vm67_vm0, %v225_v53, %v229_v43 }
 0x1f2   :  { %v167_v46 = vadd.f32 %v165_v26, %v129_v4 }
 0x1f3   :  { %v176_v28 = vpop.permute.xlu0 %175  ;;  %v1276_v31 = vpop.permute.xlu2 %238 }
 0x1f4   :  { %v178_v55 = vsel %vm177_vm4, %v1228_v7, %v176_v28  ;;  %v179_v6 = vsel %vm177_vm4, %v176_v28, %v1228_v7  ;;  %v1376_v7 = vsel %vm1243_vm8, 1.0, %v1160_v24  ;;  %vm369_vm8 = vmand %vm33_vm3, %vm1272_vm13 }
 0x1f5   :  { %v189_v2 = vmul.f32 %v185_v57, %v178_v55  ;;  %v188_v28 = vmul.f32 %v186_v11, %v179_v6  ;;  %v315_v44 = vmul.f32 %v1376_v7, %v314_v62  ;;  %v1408_v15 = vsel %vm369_vm8, 1.0, %v1160_v24 }
 0x1f6   :  { %v285_v55 = vperm.slane %v281_v29, 0 }
 0x1f7   :  { %v192_v19 = vrot.slane %v189_v2, 6  ;;  %v317_v61 = vperm.slane %v315_v44, 0  ;;  %v376_v2 = vmul.f32 %v1408_v15, %v374_v10  ;;  %v388_v44 = vstv %s1070_s15  ;;  %s1096_s15 = sld [smem:[#allocation2 + $0x29]] }
 0x1f9   :  { %v193_v49 = vsel %vm67_vm0, %v188_v28, %v192_v19  ;;  %v378_v14 = vperm.slane %v376_v2, 0 }
 0x1fa   :  { %v195_v57 = vadd.f32 %v193_v49, %v167_v46 }
 0x1fb   :  { %v272_v59 = vpop.permute.xlu2 %271 }
 0x1fc   :  { %v232_v27 = vadd.f32 %v230_v3, %v195_v57 }
 0x203   :  { %v241_v48 = vpop.permute.xlu1 %240  ;;  %v333_v50 = vpop.permute.xlu2 %332 }
 0x204   :  { %v243_v17 = vsel %vm242_vm7, %v1276_v31, %v241_v48  ;;  %v244_v30 = vsel %vm242_vm7, %v241_v48, %v1276_v31  ;;  %v1416_v31 = vsel %vm1266_vm12, 1.0, %v1160_v24  ;;  %vm364_vm12 = vcmp.lt.s32.totalorder %v1194_v22, 111 }
 0x205   :  { %v257_v36 = vmul.f32 %v255_v12, %v243_v17  ;;  %v256_v48 = vmul.f32 %v254_v52, %v244_v30  ;;  %v375_v24 = vmul.f32 %v1416_v31, %v374_v10 }
 0x207   :  { %v260_v54 = vrot.slane %v257_v36, 6  ;;  %v377_v19 = vperm.slane %v375_v24, 0 }
 0x20b   :  { %v1321_v47 = vpop.permute.xlu0 %269  ;;  %v363_v52 = vpop.permute.xlu2 %362 }
 0x20c   :  { %v275_v32 = vsel %vm273_vm9, %v272_v59, %v1321_v47  ;;  %v274_v60 = vsel %vm273_vm9, %v1321_v47, %v272_v59  ;;  %v261_v59 = vsel %vm67_vm0, %v256_v48, %v260_v54 }
 0x20d   :  { %v288_v51 = vmul.f32 %v286_v21, %v275_v32  ;;  %v287_v8 = vmul.f32 %v285_v55, %v274_v60  ;;  %v263_v16 = vadd.f32 %v261_v59, %v232_v27 }
 0x20f   :  { %v291_v0 = vrot.slane %v288_v51, 6 }
 0x211   :  { %v292_v6 = vsel %vm67_vm0, %v287_v8, %v291_v0 }
 0x213   :  { %v303_v23 = vpop.permute.xlu0 %302 }
 0x214   :  { %v301_v18 = vpop.permute.xlu1 %300 }
 0x215   :  { %v306_v45 = vsel %vm304_vm10, %v303_v23, %v301_v18  ;;  %v305_v4 = vsel %vm304_vm10, %v301_v18, %v303_v23  ;;  %v294_v23 = vadd.f32 %v292_v6, %v263_v16 }
 0x216   :  { %v320_v56 = vmul.f32 %v318_v38, %v306_v45  ;;  %v319_v12 = vmul.f32 %v317_v61, %v305_v4 }
 0x218   :  { %v323_v9 = vrot.slane %v320_v56, 6 }
 0x21a   :  { %v324_v17 = vsel %vm67_vm0, %v319_v12, %v323_v9 }
 0x21b   :  { %v326_v36 = vadd.f32 %v324_v17, %v294_v23 }
 0x21c   :  { %v335_v62 = vpop.permute.xlu1 %334 }
 0x21d   :  { %v338_v1 = vsel %vm336_vm11, %v335_v62, %v333_v50  ;;  %v337_v11 = vsel %vm336_vm11, %v333_v50, %v335_v62 }
 0x21e   :  { %v348_v47 = vmul.f32 %v346_v34, %v338_v1  ;;  %v347_v18 = vmul.f32 %v344_v39, %v337_v11 }
 0x220   :  { %v351_v13 = vrot.slane %v348_v47, 6 }
 0x222   :  { %v352_v29 = vsel %vm67_vm0, %v347_v18, %v351_v13  ;;  %v449_v18 = vstv %s1072_s17  ;;  %s1098_s17 = sld [smem:[#allocation2 + $0x2b]] }
 0x223   :  { %v361_v21 = vpop.permute.xlu0 %360  ;;  %v354_v43 = vadd.f32 %v352_v29, %v326_v36 }
 0x224   :  { %v365_v26 = vsel %vm364_vm12, %v361_v21, %v363_v52  ;;  %v366_v28 = vsel %vm364_vm12, %v363_v52, %v361_v21 }
 0x225   :  { %v380_v32 = vmul.f32 %v378_v14, %v366_v28  ;;  %v379_v38 = vmul.f32 %v377_v19, %v365_v26  ;;  %v442_v14 = vstv %s1071_s16  ;;  %s1097_s16 = sld [smem:[#allocation2 + $0x2a]] }
 0x227   :  { %v383_v20 = vrot.slane %v380_v32, 6  ;;  %v462_v32 = vstv %s1073_s18 }
 0x229   :  { %v384_v45 = vsel %vm67_vm0, %v379_v38, %v383_v20  ;;  %v465_v38 = vstv %s1074_s20 }
 0x22a   :  { %v386_v39 = vadd.f32 %v384_v45, %v354_v43 }
 0x22c   :  { %v389_v46 = vadd.f32 %v388_v44, %v386_v39 }
 0x22e   :  { %v390_v49 = vmul.f32 %v389_v46, %v389_v46  ;;  %393 = vst [vmem:[#allocation1] ss:$4 sm:$0xff] %v389_v46 }
 0x230   :  { %397 = vst [vmem:[#allocation1 + $0x20] ss:$4 sm:$0xff] %v390_v49 }
 0x235   :  { %v394_v50 = vld.sshfl [vmem:[#allocation1] sm:$0xff pattern:$0x73625140]  ;;  %v395_v51 = vld.sshfl [vmem:[#allocation1 + $0x8] sm:$0xff pattern:$0x73625140] }
 0x236   :  { %v404_v30 = vsel %vm67_vm0, %v394_v50, 0.0  ;;  %v405_v34 = vsel %vm67_vm0, %v395_v51, 0.0 }
 0x237   :  { %v406_v10 = vadd.f32 %v405_v34, %v404_v30  ;;  %v398_v53 = vld.sshfl [vmem:[#allocation1 + $0x20] sm:$0xff pattern:$0x73625140]  ;;  %v399_v54 = vld.sshfl [vmem:[#allocation1 + $0x28] sm:$0xff pattern:$0x73625140] }
 0x238   :  { %v409_v55 = vsel %vm67_vm0, %v398_v53, 0.0  ;;  %v410_v56 = vsel %vm67_vm0, %v399_v54, 0.0 }
 0x239   :  { %407 = vadd.xlane.f32.xlu1 %v406_v10  ;;  %v411_v57 = vadd.f32 %v410_v56, %v409_v55 }
 0x23b   :  { %412 = vadd.xlane.f32.xlu0 %v411_v57 }
 0x2ac   :  { %v408_v60 = vpop.xlane.xlu1 %407 }
 0x2ad   :  { %v416_v62 = vperm.slane %v408_v60, %v1194_v22 }
 0x2ae   :  { %v413_v61 = vpop.xlane.xlu0 %412 }
 0x2af   :  { %v417_v48 = vperm.slane %v413_v61, %v1194_v22 }
 0x2b1   :  { %v418_v0 = vsel %vm82_vm1, %v417_v48, %v416_v62 }
 0x2b2   :  { %v420_v1 = vsel %vm85_vm2, %v418_v0, 0.0 }
 0x2b3   :  { %421 = vadd.xlane.f32.xlu2 %v420_v1 }
 0x326   :  { %v422_v2 = vpop.xlane.xlu2 %421 }
 0x327   :  { %v423_v3 = vmul.f32 0.001953125, %v422_v2 }
 0x329   :  { %v424_v4 = vmul.f32 %v423_v3, %v423_v3 }
 0x32b   :  { %v426_v47 = vrot.slane %v424_v4, 7 }
 0x32d   :  { %v428_v59 = vsub.f32 %v423_v3, %v426_v47 }
 0x32f   :  { %v429_v8 = vmax.f32 %v428_v59, 0.0 }
 0x331   :  { %v430_v9 = vadd.f32 1e-05, %v429_v8  ;;  %v488_v8 = vstv %s1076_s0 }
 0x333   :  { %1128 = vrsqrt.f32 %v430_v9  ;;  %vm437_vm14 = vweird.f32 %v430_v9 }
 0x339   :  { %v1129_v24 = vpop.eup %1128 }
 0x33a   :  { %v432_v27 = vmul.f32 %v1129_v24, %v430_v9  ;;  %vm438_vm13 = vweird.f32 %v1129_v24  ;;  %v490_v9 = vmul.f32 %v1259_v25, %v488_v8 }
 0x33b   :  { %vm439_vm3 = vmor %vm437_vm14, %vm438_vm13 }
 0x33c   :  { %v433_v11 = vmul.f32 %v1129_v24, %v432_v27  ;;  %v536_v27 = vstv %s1078_s22 }
 0x33e   :  { %v434_v6 = vmul.f32 0.5, %v433_v11 }
 0x340   :  { %v435_v12 = vsub.f32 1.5, %v434_v6  ;;  %v590_v6 = vstv %s1080_s23 }
 0x342   :  { %v436_v13 = vmul.f32 %v1129_v24, %v435_v12 }
 0x344   :  { %v440_v16 = vsel %vm439_vm3, %v1129_v24, %v436_v13  ;;  %v561_v24 = vstv %s1079_s2 }
 0x345   :  { %v443_v52 = vmul.f32 %v442_v14, %v440_v16  ;;  %v562_v13 = vmul.f32 %v1300_v37, %v561_v24  ;;  %v492_v14 = vperm.slane %v490_v9, 0  ;;  %v538_v16 = vmul.f32 %v1295_v35, %v536_v27 }
 0x347   :  { %v446_v17 = vrot.slane %v443_v52, 1 }
 0x349   :  { %1103 = vpush %v446_v17  ;;  %v448_v19 = vmul.f32 %v446_v17, %v423_v3 }
 0x34b   :  { %v450_v21 = vsub.f32 %v449_v18, %v448_v19  ;;  %v591_v18 = vmul.f32 %v1311_v42, %v590_v6  ;;  %v489_v19 = vmul.f32 %v1280_v33, %v488_v8 }
 0x34d   :  { %1105 = vpush %v450_v21  ;;  %v473_v21 = vstv %s1075_s5 }
 0x37a   :  { %s1104_s19 = spop %1103 }
 0x37b   :  { %v452_v23 = vstv %s1104_s19 }
 0x37c   :  { %v454_v26 = vmul.f32 %v452_v23, %v389_v46  ;;  %v565_v23 = vperm.slane %v562_v13, 4 }
 0x37e   :  { %s1106_s21 = spop %1105 }
 0x37f   :  { %v457_v28 = vstv %s1106_s21 }
 0x380   :  { %v459_v29 = vadd.f32 %v457_v28, %v454_v26 }
 0x382   :  { %v460_v36 = vmax.f32 %v459_v29, 0.0  ;;  %v540_v29 = vperm.slane %v538_v16, 0 }
 0x384   :  { %v463_v20 = vmul.f32 %v462_v32, %v460_v36  ;;  %v619_v32 = vstv %s1473_s6  ;;  %v513_v36 = vstv %s1475_s7 }
 0x386   :  { %v466_v43 = vadd.f32 %v465_v38, %v463_v20  ;;  %v537_v38 = vmul.f32 %v1307_v40, %v536_v27 }
 0x388   :  { %v467_v44 = vmul.f32 0.5, %v466_v43  ;;  %v594_v43 = vperm.slane %v591_v18, 4 }
 0x38a   :  { %1130 = vtanh.f32 %v467_v44  ;;  %v491_v44 = vperm.slane %v489_v19, 0  ;;  %v667_v19 = vstv %s1493_s8 }
 0x390   :  { %v1131_v45 = vpop.eup %1130 }
 0x391   :  { %v469_v39 = vmul.f32 0.5, %v1131_v45 }
 0x393   :  { %v470_v49 = vadd.f32 0.5, %v469_v39 }
 0x395   :  { %v1446_v50 = vmul.f32 %v470_v49, %v1187_v5 }
 0x397   :  { %476 = vst [vmem:[#allocation1] ss:$4 sm:$0xff] %v1446_v50  ;;  %v474_v45 = vmul.f32 %v473_v21, %v1446_v50 }
 0x39e   :  { %v478_v51 = vld.sshfl [vmem:[#allocation1 + $0x8] sm:$0xff pattern:$0x73625140]  ;;  %v477_v46 = vld.sshfl [vmem:[#allocation1] sm:$0xff pattern:$0x73625140] }
 0x39f   :  { %483 = vrot.lane.b32.xlu0 %v478_v51, %s1151_s24  ;;  %481 = vrot.lane.b32.xlu1 %v477_v46, %s1151_s24  ;;  %501 = vst [vmem:[#allocation1] ss:$4 sm:$0xff] %v1446_v50  ;;  %v569_v51 = vperm.slane %v565_v23, 0 }
 0x3a6   :  { %v503_v30 = vld.sshfl [vmem:[#allocation1 + $0x8] sm:$0xff pattern:$0x73625140]  ;;  %v502_v34 = vld.sshfl [vmem:[#allocation1] sm:$0xff pattern:$0x73625140] }
 0x3a7   :  { %508 = vrot.lane.b32.xlu0 %v503_v30, %s1152_s25  ;;  %506 = vrot.lane.b32.xlu2 %v502_v34, %s1152_s25  ;;  %524 = vst [vmem:[#allocation1] ss:$4 sm:$0xff] %v1446_v50  ;;  %v621_v30 = vmul.f32 %v1349_v63, %v619_v32 }
 0x3a9   :  { %v623_v24 = vperm.slane %v621_v30, 0 }
 0x3ae   :  { %v526_v5 = vld.sshfl [vmem:[#allocation1 + $0x8] sm:$0xff pattern:$0x73625140]  ;;  %v525_v10 = vld.sshfl [vmem:[#allocation1] sm:$0xff pattern:$0x73625140] }
 0x3af   :  { %531 = vrot.lane.b32.xlu2 %v526_v5, %s1153_s26  ;;  %529 = vrot.lane.b32.xlu1 %v525_v10, %s1153_s26  ;;  %549 = vst [vmem:[#allocation1] ss:$4 sm:$0xff] %v1446_v50  ;;  %v514_v10 = vmul.f32 %v1342_v58, %v513_v36 }
 0x3b6   :  { %v551_v53 = vld.sshfl [vmem:[#allocation1 + $0x8] sm:$0xff pattern:$0x73625140]  ;;  %v550_v54 = vld.sshfl [vmem:[#allocation1] sm:$0xff pattern:$0x73625140] }
 0x3b7   :  { %556 = vrot.lane.b32.xlu1 %v551_v53, %s1154_s27  ;;  %554 = vrot.lane.b32.xlu0 %v550_v54, %s1154_s27  ;;  %578 = vst [vmem:[#allocation1] ss:$4 sm:$0xff] %v1446_v50 }
 0x3be   :  { %v580_v55 = vld.sshfl [vmem:[#allocation1 + $0x8] sm:$0xff pattern:$0x73625140]  ;;  %v579_v56 = vld.sshfl [vmem:[#allocation1] sm:$0xff pattern:$0x73625140] }
 0x3bf   :  { %585 = vrot.lane.b32.xlu0 %v580_v55, %s1155_s28  ;;  %583 = vrot.lane.b32.xlu2 %v579_v56, %s1155_s28  ;;  %607 = vst [vmem:[#allocation1] ss:$4 sm:$0xff] %v1446_v50  ;;  %v539_v55 = vperm.slane %v537_v38, 0  ;;  %v564_v56 = vperm.slane %v562_v13, 0  ;;  %v620_v13 = vmul.f32 %v1376_v7, %v619_v32 }
 0x3c6   :  { %v609_v57 = vld.sshfl [vmem:[#allocation1 + $0x8] sm:$0xff pattern:$0x73625140]  ;;  %v608_v60 = vld.sshfl [vmem:[#allocation1] sm:$0xff pattern:$0x73625140] }
 0x3c7   :  { %614 = vrot.lane.b32.xlu2 %v609_v57, %s1156_s29  ;;  %612 = vrot.lane.b32.xlu1 %v608_v60, %s1156_s29  ;;  %632 = vst [vmem:[#allocation1] ss:$4 sm:$0xff] %v1446_v50  ;;  %v593_v57 = vperm.slane %v591_v18, 0  ;;  %v598_v60 = vperm.slane %v594_v43, 0 }
 0x3ce   :  { %v634_v61 = vld.sshfl [vmem:[#allocation1 + $0x8] sm:$0xff pattern:$0x73625140]  ;;  %v633_v62 = vld.sshfl [vmem:[#allocation1] sm:$0xff pattern:$0x73625140] }
 0x3cf   :  { %639 = vrot.lane.b32.xlu1 %v634_v61, %s1157_s30  ;;  %637 = vrot.lane.b32.xlu0 %v633_v62, %s1157_s30  ;;  %655 = vst [vmem:[#allocation1] ss:$4 sm:$0xff] %v1446_v50 }
 0x3d6   :  { %v657_v48 = vld.sshfl [vmem:[#allocation1 + $0x8] sm:$0xff pattern:$0x73625140]  ;;  %v656_v0 = vld.sshfl [vmem:[#allocation1] sm:$0xff pattern:$0x73625140] }
 0x3d7   :  { %662 = vrot.lane.b32.xlu0 %v657_v48, %s1158_s4  ;;  %660 = vrot.lane.b32.xlu2 %v656_v0, %s1158_s4  ;;  %v644_v0 = vstv %s1483_s1 }
 0x401   :  { %v507_v3 = vpop.permute.xlu2 %506 }
 0x409   :  { %v532_v59 = vpop.permute.xlu2 %531 }
 0x411   :  { %v484_v1 = vpop.permute.xlu0 %483  ;;  %v482_v2 = vpop.permute.xlu1 %481 }
 0x412   :  { %v485_v52 = vsel %vm140_vm15, %v482_v2, %v484_v1  ;;  %v486_v39 = vsel %vm140_vm15, %v484_v1, %v482_v2 }
 0x413   :  { %v494_v26 = vmul.f32 %v492_v14, %v485_v52  ;;  %v493_v61 = vmul.f32 %v491_v44, %v486_v39  ;;  %v568_v14 = vperm.slane %v564_v56, 0  ;;  %v646_v52 = vmul.f32 %v1387_v41, %v644_v0 }
 0x415   :  { %v497_v5 = vrot.slane %v494_v26, 6 }
 0x417   :  { %v498_v27 = vsel %vm67_vm0, %v493_v61, %v497_v5 }
 0x418   :  { %v500_v21 = vadd.f32 %v498_v27, %v474_v45  ;;  %v669_v45 = vmul.f32 %v1408_v15, %v667_v19 }
 0x419   :  { %v509_v4 = vpop.permute.xlu0 %508  ;;  %v584_v17 = vpop.permute.xlu2 %583 }
 0x41a   :  { %v510_v28 = vsel %vm177_vm4, %v507_v3, %v509_v4  ;;  %v511_v62 = vsel %vm177_vm4, %v509_v4, %v507_v3  ;;  %v671_v56 = vperm.slane %v669_v45, 0 }
 0x41b   :  { %v517_v49 = vmul.f32 %v513_v36, %v510_v28  ;;  %v516_v4 = vmul.f32 %v514_v10, %v511_v62  ;;  %v668_v10 = vmul.f32 %v1416_v31, %v667_v19 }
 0x41d   :  { %v520_v1 = vrot.slane %v517_v49, 6  ;;  %v670_v62 = vperm.slane %v668_v10, 0 }
 0x41f   :  { %v521_v23 = vsel %vm67_vm0, %v516_v4, %v520_v1  ;;  %v681_v4 = vstv %s1084_s9 }
 0x420   :  { %v523_v39 = vadd.f32 %v521_v23, %v500_v21 }
 0x421   :  { %v530_v47 = vpop.permute.xlu1 %529  ;;  %v615_v8 = vpop.permute.xlu2 %614 }
 0x422   :  { %v533_v20 = vsel %vm205_vm6, %v530_v47, %v532_v59  ;;  %v534_v2 = vsel %vm205_vm6, %v532_v59, %v530_v47  ;;  %v597_v59 = vperm.slane %v593_v57, 0 }
 0x423   :  { %v542_v53 = vmul.f32 %v540_v29, %v533_v20  ;;  %v541_v18 = vmul.f32 %v539_v55, %v534_v2  ;;  %v622_v20 = vperm.slane %v620_v13, 0 }
 0x425   :  { %v545_v6 = vrot.slane %v542_v53, 6 }
 0x427   :  { %v546_v36 = vsel %vm67_vm0, %v541_v18, %v545_v6 }
 0x429   :  { %v555_v11 = vpop.permute.xlu0 %554  ;;  %v557_v12 = vpop.permute.xlu1 %556 }
 0x42a   :  { %v558_v54 = vsel %vm242_vm7, %v555_v11, %v557_v12  ;;  %v559_v47 = vsel %vm242_vm7, %v557_v12, %v555_v11 }
 0x42b   :  { %v571_v9 = vmul.f32 %v569_v51, %v558_v54  ;;  %v570_v44 = vmul.f32 %v568_v14, %v559_v47 }
 0x42d   :  { %v574_v26 = vrot.slane %v571_v9, 6 }
 0x42f   :  { %v575_v51 = vsel %vm67_vm0, %v570_v44, %v574_v26 }
 0x431   :  { %v586_v46 = vpop.permute.xlu0 %585 }
 0x432   :  { %v588_v48 = vsel %vm273_vm9, %v586_v46, %v584_v17  ;;  %v587_v38 = vsel %vm273_vm9, %v584_v17, %v586_v46  ;;  %v548_v17 = vadd.f32 %v546_v36, %v523_v39 }
 0x433   :  { %v600_v16 = vmul.f32 %v598_v60, %v588_v48  ;;  %v599_v30 = vmul.f32 %v597_v59, %v587_v38  ;;  %v661_v60 = vpop.permute.xlu2 %660 }
 0x434   :  { %v577_v57 = vadd.f32 %v575_v51, %v548_v17 }
 0x435   :  { %v603_v11 = vrot.slane %v600_v16, 6 }
 0x437   :  { %v604_v53 = vsel %vm67_vm0, %v599_v30, %v603_v11 }
 0x438   :  { %v606_v1 = vadd.f32 %v604_v53, %v577_v57 }
 0x439   :  { %v613_v34 = vpop.permute.xlu1 %612 }
 0x43a   :  { %v617_v3 = vsel %vm304_vm10, %v615_v8, %v613_v34  ;;  %v616_v49 = vsel %vm304_vm10, %v613_v34, %v615_v8 }
 0x43b   :  { %v625_v28 = vmul.f32 %v623_v24, %v617_v3  ;;  %v624_v54 = vmul.f32 %v622_v20, %v616_v49 }
 0x43d   :  { %v628_v5 = vrot.slane %v625_v28, 6 }
 0x43f   :  { %v629_v34 = vsel %vm67_vm0, %v624_v54, %v628_v5 }
 0x440   :  { %v631_v27 = vadd.f32 %v629_v34, %v606_v1 }
 0x441   :  { %v640_v29 = vpop.permute.xlu1 %639  ;;  %v638_v32 = vpop.permute.xlu0 %637 }
 0x442   :  { %v642_v43 = vsel %vm336_vm11, %v640_v29, %v638_v32  ;;  %v641_v46 = vsel %vm336_vm11, %v638_v32, %v640_v29 }
 0x443   :  { %v648_v12 = vmul.f32 %v646_v52, %v642_v43  ;;  %v647_v61 = vmul.f32 %v644_v0, %v641_v46 }
 0x445   :  { %v651_v55 = vrot.slane %v648_v12, 6 }
 0x447   :  { %v652_v9 = vsel %vm67_vm0, %v647_v61, %v651_v55  ;;  %v742_v61 = vstv %s1086_s11 }
 0x448   :  { %v654_v3 = vadd.f32 %v652_v9, %v631_v27 }
 0x449   :  { %v663_v48 = vpop.permute.xlu0 %662 }
 0x44a   :  { %v664_v2 = vsel %vm364_vm12, %v661_v60, %v663_v48  ;;  %v665_v8 = vsel %vm364_vm12, %v663_v48, %v661_v60 }
 0x44b   :  { %v673_v24 = vmul.f32 %v671_v56, %v665_v8  ;;  %v672_v6 = vmul.f32 %v670_v62, %v664_v2  ;;  %v735_v56 = vstv %s1085_s10 }
 0x44d   :  { %v676_v13 = vrot.slane %v673_v24, 6 }
 0x44f   :  { %v677_v14 = vsel %vm67_vm0, %v672_v6, %v676_v13 }
 0x450   :  { %v679_v0 = vadd.f32 %v677_v14, %v654_v3 }
 0x452   :  { %v682_v16 = vadd.f32 %v681_v4, %v679_v0 }
 0x454   :  { %v683_v52 = vmul.f32 %v682_v16, %v682_v16  ;;  %686 = vst [vmem:[#allocation1] ss:$4 sm:$0xff] %v682_v16 }
 0x456   :  { %690 = vst [vmem:[#allocation1 + $0x20] ss:$4 sm:$0xff] %v683_v52 }
 0x45b   :  { %v687_v18 = vld.sshfl [vmem:[#allocation1] sm:$0xff pattern:$0x73625140]  ;;  %v688_v47 = vld.sshfl [vmem:[#allocation1 + $0x8] sm:$0xff pattern:$0x73625140] }
 0x45c   :  { %v697_v59 = vsel %vm67_vm0, %v687_v18, 0.0  ;;  %v698_v19 = vsel %vm67_vm0, %v688_v47, 0.0 }
 0x45d   :  { %v699_v21 = vadd.f32 %v698_v19, %v697_v59  ;;  %v691_v23 = vld.sshfl [vmem:[#allocation1 + $0x20] sm:$0xff pattern:$0x73625140]  ;;  %v692_v26 = vld.sshfl [vmem:[#allocation1 + $0x28] sm:$0xff pattern:$0x73625140] }
 0x45e   :  { %v702_v28 = vsel %vm67_vm0, %v691_v23, 0.0  ;;  %v703_v29 = vsel %vm67_vm0, %v692_v26, 0.0 }
 0x45f   :  { %700 = vadd.xlane.f32.xlu1 %v699_v21  ;;  %v704_v32 = vadd.f32 %v703_v29, %v702_v28 }
 0x461   :  { %705 = vadd.xlane.f32.xlu2 %v704_v32 }
 0x4d2   :  { %v701_v36 = vpop.xlane.xlu1 %700 }
 0x4d3   :  { %v709_v20 = vperm.slane %v701_v36, %v1194_v22 }
 0x4d4   :  { %v706_v38 = vpop.xlane.xlu2 %705 }
 0x4d5   :  { %v710_v43 = vperm.slane %v706_v38, %v1194_v22 }
 0x4d7   :  { %v711_v44 = vsel %vm82_vm1, %v710_v43, %v709_v20 }
 0x4d8   :  { %v713_v11 = vsel %vm85_vm2, %v711_v44, 0.0 }
 0x4d9   :  { %714 = vadd.xlane.f32.xlu0 %v713_v11 }
 0x54c   :  { %v715_v12 = vpop.xlane.xlu0 %714 }
 0x54d   :  { %v716_v45 = vmul.f32 0.001953125, %v715_v12 }
 0x54f   :  { %v717_v39 = vmul.f32 %v716_v45, %v716_v45 }
 0x551   :  { %v719_v49 = vrot.slane %v717_v39, 7 }
 0x553   :  { %v721_v51 = vsub.f32 %v716_v45, %v719_v49 }
 0x555   :  { %v722_v30 = vmax.f32 %v721_v51, 0.0 }
 0x557   :  { %v723_v5 = vadd.f32 1e-05, %v722_v30 }
 0x559   :  { %1132 = vrsqrt.f32 %v723_v5  ;;  %vm730_vm8 = vweird.f32 %v723_v5 }
 0x55f   :  { %v1133_v10 = vpop.eup %1132 }
 0x560   :  { %v725_v17 = vmul.f32 %v1133_v10, %v723_v5  ;;  %vm731_vm5 = vweird.f32 %v1133_v10 }
 0x561   :  { %vm732_vm13 = vmor %vm730_vm8, %vm731_vm5 }
 0x562   :  { %v726_v46 = vmul.f32 %v1133_v10, %v725_v17 }
 0x564   :  { %v727_v53 = vmul.f32 0.5, %v726_v46 }
 0x566   :  { %v728_v54 = vsub.f32 1.5, %v727_v53 }
 0x568   :  { %v729_v55 = vmul.f32 %v1133_v10, %v728_v54 }
 0x56a   :  { %v733_v57 = vsel %vm732_vm13, %v1133_v10, %v729_v55 }
 0x56b   :  { %v736_v60 = vmul.f32 %v735_v56, %v733_v57 }
 0x56d   :  { %v739_v34 = vrot.slane %v736_v60, 1 }
 0x56f   :  { %1107 = vpush %v739_v34  ;;  %v741_v62 = vmul.f32 %v739_v34, %v716_v45 }
 0x571   :  { %v743_v48 = vsub.f32 %v742_v61, %v741_v62 }
 0x573   :  { %1109 = vpush %v743_v48 }
 0x5a0   :  { %s1108_s12 = spop %1107 }
 0x5a1   :  { %v745_v1 = vstv %s1108_s12 }
 0x5a2   :  { %v747_v2 = vmul.f32 %v745_v1, %v682_v16 }
 0x5a4   :  { %s1110_s13 = spop %1109 }
 0x5a5   :  { %v750_v8 = vstv %s1110_s13 }
 0x5a6   :  { %v752_v9 = vadd.f32 %v750_v8, %v747_v2 }
 0x5a8   :  { %v1545_v24 = vmax.f32 %v752_v9, 0.0 }
 0x5aa   :  { %758 = vst [vmem:[#allocation1] ss:$4 sm:$0xff] %v1545_v24 }
 0x5b1   :  { %v760_v27 = vld.sshfl [vmem:[#allocation1 + $0x8] sm:$0xff pattern:$0x73625140]  ;;  %v759_v6 = vld.sshfl [vmem:[#allocation1] sm:$0xff pattern:$0x73625140] }
 0x5b2   :  { %765 = vrot.lane.b32.xlu2 %v760_v27, %s1151_s24  ;;  %763 = vrot.lane.b32.xlu1 %v759_v6, %s1151_s24  ;;  %783 = vst [vmem:[#allocation1] ss:$4 sm:$0xff] %v1545_v24  ;;  %s1088_s24 = sld [smem:[#allocation2 + $0x20]] }
 0x5b8   :  { %v770_v43 = vstv %s1088_s24 }
 0x5b9   :  { %v785_v13 = vld.sshfl [vmem:[#allocation1 + $0x8] sm:$0xff pattern:$0x73625140]  ;;  %v784_v3 = vld.sshfl [vmem:[#allocation1] sm:$0xff pattern:$0x73625140]  ;;  %v772_v44 = vmul.f32 %v1259_v25, %v770_v43  ;;  %v771_v46 = vmul.f32 %v1280_v33, %v770_v43 }
 0x5ba   :  { %790 = vrot.lane.b32.xlu1 %v785_v13, %s1152_s25  ;;  %788 = vrot.lane.b32.xlu0 %v784_v3, %s1152_s25  ;;  %806 = vst [vmem:[#allocation1] ss:$4 sm:$0xff] %v1545_v24  ;;  %s1091_s25 = sld [smem:[#allocation2 + $0x23]] }
 0x5bb   :  { %v774_v30 = vperm.slane %v772_v44, 0 }
 0x5c0   :  { %v843_v11 = vstv %s1091_s25 }
 0x5c1   :  { %v808_v4 = vld.sshfl [vmem:[#allocation1 + $0x8] sm:$0xff pattern:$0x73625140]  ;;  %v807_v14 = vld.sshfl [vmem:[#allocation1] sm:$0xff pattern:$0x73625140]  ;;  %v844_v51 = vmul.f32 %v1300_v37, %v843_v11  ;;  %v949_v11 = vstv %s1592_s14 }
 0x5c2   :  { %813 = vrot.lane.b32.xlu2 %v808_v4, %s1153_s26  ;;  %811 = vrot.lane.b32.xlu0 %v807_v14, %s1153_s26  ;;  %831 = vst [vmem:[#allocation1] ss:$4 sm:$0xff] %v1545_v24  ;;  %s1090_s26 = sld [smem:[#allocation2 + $0x22]] }
 0x5c3   :  { %v847_v54 = vperm.slane %v844_v51, 4  ;;  %v846_v3 = vperm.slane %v844_v51, 0 }
 0x5c5   :  { %v851_v1 = vperm.slane %v847_v54, 0  ;;  %v951_v54 = vmul.f32 %v1408_v15, %v949_v11 }
 0x5c8   :  { %v818_v12 = vstv %s1090_s26 }
 0x5c9   :  { %v833_v0 = vld.sshfl [vmem:[#allocation1 + $0x8] sm:$0xff pattern:$0x73625140]  ;;  %v832_v16 = vld.sshfl [vmem:[#allocation1] sm:$0xff pattern:$0x73625140]  ;;  %v820_v5 = vmul.f32 %v1295_v35, %v818_v12  ;;  %v819_v35 = vmul.f32 %v1307_v40, %v818_v12 }
 0x5ca   :  { %838 = vrot.lane.b32.xlu0 %v833_v0, %s1154_s27  ;;  %836 = vrot.lane.b32.xlu1 %v832_v16, %s1154_s27  ;;  %860 = vst [vmem:[#allocation1] ss:$4 sm:$0xff] %v1545_v24  ;;  %s1092_s27 = sld [smem:[#allocation2 + $0x25]] }
 0x5cb   :  { %v822_v37 = vperm.slane %v820_v5, 0 }
 0x5d0   :  { %v872_v39 = vstv %s1092_s27 }
 0x5d1   :  { %v862_v52 = vld.sshfl [vmem:[#allocation1 + $0x8] sm:$0xff pattern:$0x73625140]  ;;  %v861_v18 = vld.sshfl [vmem:[#allocation1] sm:$0xff pattern:$0x73625140]  ;;  %v873_v17 = vmul.f32 %v1311_v42, %v872_v39 }
 0x5d2   :  { %867 = vrot.lane.b32.xlu1 %v862_v52, %s1155_s28  ;;  %865 = vrot.lane.b32.xlu2 %v861_v18, %s1155_s28  ;;  %889 = vst [vmem:[#allocation1] ss:$4 sm:$0xff] %v1545_v24  ;;  %s1087_s28 = sld [smem:[#allocation2 + $0x24]]  ;;  %v773_v42 = vperm.slane %v771_v46, 0 }
 0x5d3   :  { %v876_v61 = vperm.slane %v873_v17, 4  ;;  %v875_v4 = vperm.slane %v873_v17, 0 }
 0x5d5   :  { %v880_v14 = vperm.slane %v876_v61, 0 }
 0x5d8   :  { %v755_v53 = vstv %s1087_s28 }
 0x5d9   :  { %v891_v47 = vld.sshfl [vmem:[#allocation1 + $0x8] sm:$0xff pattern:$0x73625140]  ;;  %v890_v59 = vld.sshfl [vmem:[#allocation1] sm:$0xff pattern:$0x73625140]  ;;  %v756_v33 = vmul.f32 %v755_v53, %v1545_v24 }
 0x5da   :  { %896 = vrot.lane.b32.xlu2 %v891_v47, %s1156_s29  ;;  %894 = vrot.lane.b32.xlu0 %v890_v59, %s1156_s29  ;;  %914 = vst [vmem:[#allocation1] ss:$4 sm:$0xff] %v1545_v24  ;;  %s1572_s29 = sld [smem:[#allocation2 + $0x26]] }
 0x5e0   :  { %v901_v57 = vstv %s1572_s29 }
 0x5e1   :  { %v916_v19 = vld.sshfl [vmem:[#allocation1 + $0x8] sm:$0xff pattern:$0x73625140]  ;;  %v915_v21 = vld.sshfl [vmem:[#allocation1] sm:$0xff pattern:$0x73625140]  ;;  %v903_v8 = vmul.f32 %v1349_v63, %v901_v57 }
 0x5e2   :  { %921 = vrot.lane.b32.xlu0 %v916_v19, %s1157_s30  ;;  %919 = vrot.lane.b32.xlu1 %v915_v21, %s1157_s30  ;;  %937 = vst [vmem:[#allocation1] ss:$4 sm:$0xff] %v1545_v24  ;;  %s1574_s30 = sld [smem:[#allocation2 + $0x21]]  ;;  %v821_v24 = vperm.slane %v819_v35, 0  ;;  %v950_v35 = vmul.f32 %v1416_v31, %v949_v11 }
 0x5e3   :  { %v905_v19 = vperm.slane %v903_v8, 0 }
 0x5e4   :  { %v952_v8 = vperm.slane %v950_v35, 0 }
 0x5e8   :  { %v795_v60 = vstv %s1574_s30 }
 0x5e9   :  { %v939_v23 = vld.sshfl [vmem:[#allocation1 + $0x8] sm:$0xff pattern:$0x73625140]  ;;  %v938_v26 = vld.sshfl [vmem:[#allocation1] sm:$0xff pattern:$0x73625140]  ;;  %v796_v27 = vmul.f32 %v1342_v58, %v795_v60 }
 0x5ea   :  { %944 = vrot.lane.b32.xlu1 %v939_v23, %s1158_s4  ;;  %942 = vrot.lane.b32.xlu2 %v938_v26, %s1158_s4  ;;  %s1582_s4 = sld [smem:[#allocation2 + $0x27]]  ;;  %v902_v26 = vmul.f32 %v1376_v7, %v901_v57 }
 0x5ec   :  { %v904_v46 = vperm.slane %v902_v26, 0 }
 0x5f0   :  { %v926_v63 = vstv %s1582_s4 }
 0x5f1   :  { %v928_v43 = vmul.f32 %v1387_v41, %v926_v63 }
 0x60c   :  { %v766_v32 = vpop.permute.xlu2 %765 }
 0x61c   :  { %v814_v20 = vpop.permute.xlu2 %813 }
 0x624   :  { %v764_v28 = vpop.permute.xlu1 %763 }
 0x625   :  { %v767_v10 = vsel %vm140_vm15, %v764_v28, %v766_v32  ;;  %v768_v62 = vsel %vm140_vm15, %v766_v32, %v764_v28  ;;  %v850_v32 = vperm.slane %v846_v3, 0 }
 0x626   :  { %v776_v55 = vmul.f32 %v774_v30, %v767_v10  ;;  %v775_v0 = vmul.f32 %v773_v42, %v768_v62  ;;  %v953_v62 = vperm.slane %v951_v54, 0 }
 0x628   :  { %v779_v40 = vrot.slane %v776_v55, 6 }
 0x62a   :  { %v780_v21 = vsel %vm67_vm0, %v775_v0, %v779_v40  ;;  %v963_v0 = vstv %s1096_s15 }
 0x62b   :  { %v782_v12 = vadd.f32 %v780_v21, %v756_v33 }
 0x62c   :  { %v789_v29 = vpop.permute.xlu0 %788  ;;  %v791_v36 = vpop.permute.xlu1 %790 }
 0x62d   :  { %v866_v25 = vpop.permute.xlu2 %865  ;;  %v792_v56 = vsel %vm177_vm4, %v789_v29, %v791_v36  ;;  %v793_v16 = vsel %vm177_vm4, %v791_v36, %v789_v29 }
 0x62e   :  { %v799_v48 = vmul.f32 %v795_v60, %v792_v56  ;;  %v798_v29 = vmul.f32 %v796_v27, %v793_v16 }
 0x630   :  { %v802_v18 = vrot.slane %v799_v48, 6 }
 0x632   :  { %v803_v39 = vsel %vm67_vm0, %v798_v29, %v802_v18 }
 0x633   :  { %v805_v55 = vadd.f32 %v803_v39, %v782_v12 }
 0x634   :  { %v812_v38 = vpop.permute.xlu0 %811 }
 0x635   :  { %v815_v34 = vsel %vm205_vm6, %v812_v38, %v814_v20  ;;  %v816_v58 = vsel %vm205_vm6, %v814_v20, %v812_v38  ;;  %v897_v47 = vpop.permute.xlu2 %896  ;;  %v879_v20 = vperm.slane %v875_v4, 0 }
 0x636   :  { %v824_v6 = vmul.f32 %v822_v37, %v815_v34  ;;  %v823_v44 = vmul.f32 %v821_v24, %v816_v58 }
 0x638   :  { %v827_v23 = vrot.slane %v824_v6, 6 }
 0x63a   :  { %v828_v10 = vsel %vm67_vm0, %v823_v44, %v827_v23 }
 0x63c   :  { %v837_v45 = vpop.permute.xlu1 %836  ;;  %v839_v49 = vpop.permute.xlu0 %838 }
 0x63d   :  { %v840_v13 = vsel %vm242_vm7, %v837_v45, %v839_v49  ;;  %v841_v38 = vsel %vm242_vm7, %v839_v49, %v837_v45 }
 0x63e   :  { %v853_v59 = vmul.f32 %v851_v1, %v840_v13  ;;  %v852_v53 = vmul.f32 %v850_v32, %v841_v38 }
 0x640   :  { %v856_v51 = vrot.slane %v853_v59, 6 }
 0x642   :  { %v857_v37 = vsel %vm67_vm0, %v852_v53, %v856_v51 }
 0x644   :  { %v868_v2 = vpop.permute.xlu1 %867  ;;  %v943_v48 = vpop.permute.xlu2 %942 }
 0x645   :  { %v870_v52 = vsel %vm273_vm9, %v868_v2, %v866_v25  ;;  %v869_v17 = vsel %vm273_vm9, %v866_v25, %v868_v2  ;;  %v830_v25 = vadd.f32 %v828_v10, %v805_v55 }
 0x646   :  { %v882_v36 = vmul.f32 %v880_v14, %v870_v52  ;;  %v881_v57 = vmul.f32 %v879_v20, %v869_v17 }
 0x647   :  { %v859_v15 = vadd.f32 %v857_v37, %v830_v25  ;;  %v1024_v37 = vstv %s1098_s17 }
 0x648   :  { %v885_v45 = vrot.slane %v882_v36, 6 }
 0x64a   :  { %v886_v61 = vsel %vm67_vm0, %v881_v57, %v885_v45 }
 0x64b   :  { %v888_v40 = vadd.f32 %v886_v61, %v859_v15 }
 0x64c   :  { %v895_v9 = vpop.permute.xlu0 %894 }
 0x64d   :  { %v899_v28 = vsel %vm304_vm10, %v897_v47, %v895_v9  ;;  %v898_v56 = vsel %vm304_vm10, %v895_v9, %v897_v47 }
 0x64e   :  { %v907_v30 = vmul.f32 %v905_v19, %v899_v28  ;;  %v906_v42 = vmul.f32 %v904_v46, %v898_v56 }
 0x650   :  { %v910_v60 = vrot.slane %v907_v30, 6 }
 0x652   :  { %v911_v1 = vsel %vm67_vm0, %v906_v42, %v910_v60 }
 0x653   :  { %v913_v24 = vadd.f32 %v911_v1, %v888_v40 }
 0x654   :  { %v922_v7 = vpop.permute.xlu0 %921  ;;  %v920_v5 = vpop.permute.xlu1 %919 }
 0x655   :  { %v924_v41 = vsel %vm336_vm11, %v922_v7, %v920_v5  ;;  %v923_v34 = vsel %vm336_vm11, %v920_v5, %v922_v7 }
 0x656   :  { %v930_v49 = vmul.f32 %v928_v43, %v924_v41  ;;  %v929_v2 = vmul.f32 %v926_v63, %v923_v34 }
 0x658   :  { %v933_v33 = vrot.slane %v930_v49, 6  ;;  %v1017_v49 = vstv %s1097_s16 }
 0x65a   :  { %v934_v6 = vsel %vm67_vm0, %v929_v2, %v933_v33 }
 0x65b   :  { %v936_v14 = vadd.f32 %v934_v6, %v913_v24 }
 0x65c   :  { %v945_v9 = vpop.permute.xlu1 %944 }
 0x65d   :  { %v946_v31 = vsel %vm364_vm12, %v943_v48, %v945_v9  ;;  %v947_v27 = vsel %vm364_vm12, %v945_v9, %v943_v48 }
 0x65e   :  { %v955_v13 = vmul.f32 %v953_v62, %v947_v27  ;;  %v954_v3 = vmul.f32 %v952_v8, %v946_v31 }
 0x660   :  { %v958_v4 = vrot.slane %v955_v13, 6 }
 0x662   :  { %v959_v16 = vsel %vm67_vm0, %v954_v3, %v958_v4 }
 0x663   :  { %v961_v52 = vadd.f32 %v959_v16, %v936_v14 }
 0x665   :  { %v964_v63 = vadd.f32 %v963_v0, %v961_v52 }
 0x667   :  { %v965_v18 = vmul.f32 %v964_v63, %v964_v63  ;;  %968 = vst [vmem:[#allocation1] ss:$4 sm:$0xff] %v964_v63 }
 0x669   :  { %972 = vst [vmem:[#allocation1 + $0x20] ss:$4 sm:$0xff] %v965_v18 }
 0x66e   :  { %v969_v58 = vld.sshfl [vmem:[#allocation1] sm:$0xff pattern:$0x73625140]  ;;  %v970_v47 = vld.sshfl [vmem:[#allocation1 + $0x8] sm:$0xff pattern:$0x73625140] }
 0x66f   :  { %v979_v59 = vsel %vm67_vm0, %v969_v58, 0.0  ;;  %v980_v19 = vsel %vm67_vm0, %v970_v47, 0.0 }
 0x670   :  { %v981_v21 = vadd.f32 %v980_v19, %v979_v59  ;;  %v973_v23 = vld.sshfl [vmem:[#allocation1 + $0x20] sm:$0xff pattern:$0x73625140]  ;;  %v974_v26 = vld.sshfl [vmem:[#allocation1 + $0x28] sm:$0xff pattern:$0x73625140] }
 0x671   :  { %v984_v28 = vsel %vm67_vm0, %v973_v23, 0.0  ;;  %v985_v29 = vsel %vm67_vm0, %v974_v26, 0.0 }
 0x672   :  { %982 = vadd.xlane.f32.xlu0 %v981_v21  ;;  %v986_v32 = vadd.f32 %v985_v29, %v984_v28 }
 0x674   :  { %987 = vadd.xlane.f32.xlu2 %v986_v32 }
 0x6e5   :  { %v983_v36 = vpop.xlane.xlu0 %982 }
 0x6e6   :  { %v991_v44 = vperm.slane %v983_v36, %v1194_v22 }
 0x6e7   :  { %v988_v43 = vpop.xlane.xlu2 %987 }
 0x6e8   :  { %v992_v38 = vperm.slane %v988_v43, %v1194_v22 }
 0x6ea   :  { %v993_v20 = vsel %vm82_vm1, %v992_v38, %v991_v44 }
 0x6eb   :  { %v995_v11 = vsel %vm85_vm2, %v993_v20, 0.0 }
 0x6ec   :  { %996 = vadd.xlane.f32.xlu1 %v995_v11 }
 0x75f   :  { %v997_v12 = vpop.xlane.xlu1 %996 }
 0x760   :  { %v998_v39 = vmul.f32 0.001953125, %v997_v12 }
 0x762   :  { %v999_v51 = vmul.f32 %v998_v39, %v998_v39 }
 0x764   :  { %v1001_v30 = vrot.slane %v999_v51, 7 }
 0x766   :  { %v1003_v7 = vsub.f32 %v998_v39, %v1001_v30 }
 0x768   :  { %v1004_v5 = vmax.f32 %v1003_v7, 0.0 }
 0x76a   :  { %v1005_v10 = vadd.f32 1e-05, %v1004_v5 }
 0x76c   :  { %1134 = vrsqrt.f32 %v1005_v10  ;;  %vm1012_vm1 = vweird.f32 %v1005_v10 }
 0x772   :  { %v1135_v17 = vpop.eup %1134 }
 0x773   :  { %v1007_v46 = vmul.f32 %v1135_v17, %v1005_v10  ;;  %vm1013_vm0 = vweird.f32 %v1135_v17 }
 0x774   :  { %vm1014_vm2 = vmor %vm1012_vm1, %vm1013_vm0 }
 0x775   :  { %v1008_v41 = vmul.f32 %v1135_v17, %v1007_v46 }
 0x777   :  { %v1009_v53 = vmul.f32 0.5, %v1008_v41 }
 0x779   :  { %v1010_v45 = vsub.f32 1.5, %v1009_v53 }
 0x77b   :  { %v1011_v22 = vmul.f32 %v1135_v17, %v1010_v45 }
 0x77d   :  { %v1015_v54 = vsel %vm1014_vm2, %v1135_v17, %v1011_v22 }
 0x77e   :  { %v1018_v55 = vmul.f32 %v1017_v49, %v1015_v54 }
 0x780   :  { %v1021_v56 = vrot.slane %v1018_v55, 1 }
 0x782   :  { %1111 = vpush %v1021_v56  ;;  %v1023_v57 = vmul.f32 %v1021_v56, %v998_v39 }
 0x784   :  { %v1025_v60 = vsub.f32 %v1024_v37, %v1023_v57 }
 0x786   :  { %1113 = vpush %v1025_v60 }
 0x7b3   :  { %s1112_s18 = spop %1111 }
 0x7b4   :  { %v1027_v35 = vstv %s1112_s18 }
 0x7b5   :  { %v1029_v25 = vmul.f32 %v1027_v35, %v964_v63 }
 0x7b7   :  { %s1114_s19 = spop %1113 }
 0x7b8   :  { %v1032_v34 = vstv %s1114_s19 }
 0x7b9   :  { %v1034_v61 = vadd.f32 %v1032_v34, %v1029_v25 }
 0x7bb   :  { %v1035_v42 = vadd.f32 %v1034_v61, %v1446_v50 }
 0x7bd   :  { %v1036_v33 = vmax.f32 %v1035_v42, 0.0 }
 0x7bf   :  { %v1037_v62 = vadd.f32 %v1036_v33, %v1036_v33 }
 0x7c1   :  { %1038 = vst [vmem:[%s1651_s3] sm:$0xf] %v1037_v62 }
 0x7c2   :  { %1043 = vsyncpa [#allocation3], 1 }

</bundles_post_ra>
